<compile_context>
chip_gen: v7x
topology: tpu7x:2x2x1
jax: 0.10.0
libtpu: 0.0.40
codegen_flags: <defaults>
</compile_context>

<pallas_src>
import functools

import jax
import jax.numpy as jnp
from jax.experimental import pallas as pl
from jax.experimental.pallas import tpu as pltpu


# ---------------------------------------------------------------------------
# Fused kernel: conv taps (single wide matmul) + ReLU + global maxpool for all
# three branches + concat + fc + softmax.
#   emb_ref  : (TB, L, E)      f32 (batch tile of the embedded sentence)
#   wcat_ref : (E, T)          f32, T = (K1+K2+K3)*C, columns grouped [branch][tap]
#   bcat_ref : (1, 3C)         f32 (conv biases, branch-concatenated)
#   fcw_ref  : (3C, O)         f32
#   fcb_ref  : (1, O)          f32
#   o_ref    : (TB, O)         f32 (softmax probabilities)
#   y_ref    : (TB, L, T)      f32 VMEM scratch holding the wide matmul result
# ---------------------------------------------------------------------------
def fused_textcnn_kernel(emb_ref, wcat_ref, bcat_ref, fcw_ref, fcb_ref,
                         o_ref, y_ref, *, kernel_sizes, num_channels,
                         mxu_dtype):
    TB, L, E = emb_ref.shape
    C = num_channels
    T = y_ref.shape[-1]                     # == sum(kernel_sizes) * C

    # ---- one wide MXU matmul: every tap of every branch, batch flattened ----
    x2d = emb_ref[...].reshape(TB * L, E).astype(mxu_dtype)
    y2d = jnp.dot(x2d, wcat_ref[...].astype(mxu_dtype),
                  preferred_element_type=jnp.float32)         # (TB*L, T) f32
    y_ref[...] = y2d.reshape(TB, L, T)

    # ---- combine the K shifted copies of Y (row shift j == conv tap j) ------
    # Shifted windows are read from the narrow VMEM-resident Y scratch, so the
    # wide emb block is touched exactly once (by the matmul above).
    pooled = []
    off = 0
    for K in kernel_sizes:
        l_out = L - K + 1
        acc = y_ref[:, 0:l_out, off:off + C]
        for j in range(1, K):
            acc = acc + y_ref[:, j:j + l_out, off + j * C:off + (j + 1) * C]
        # Global max-pool over the valid conv positions. Bias + ReLU commute
        # with the max (x -> relu(x + b) is monotone), so they are applied
        # once on the pooled feature below == PyTorch conv->ReLU->MaxPool1d.
        pooled.append(jnp.max(acc, axis=1))                   # (TB, C)
        off += K * C

    feat = jnp.concatenate(pooled, axis=1)                    # (TB, 3C), VMEM only
    feat = jnp.maximum(feat + bcat_ref[...], 0.0)             # conv bias + ReLU
    # dropout: identity (eval mode)

    # ---- fc + numerically stable softmax ------------------------------------
    logits = jnp.dot(feat.astype(mxu_dtype), fcw_ref[...].astype(mxu_dtype),
                     preferred_element_type=jnp.float32) + fcb_ref[...]
    m = jnp.max(logits, axis=-1, keepdims=True)
    e = jnp.exp(logits - m)
    denom = jnp.sum(e, axis=-1, keepdims=True)
    o_ref[...] = e * pl.reciprocal(denom, approx=True)        # EUP reciprocal


# ---------------------------------------------------------------------------
# Wrapper: embedding gather (fused with the (L,B)->(B,L) permute) + one fused
# pallas_call gridded over batch.
# ---------------------------------------------------------------------------
@functools.partial(jax.jit, static_argnames=("block_b", "mxu_dtype"))
def text_cnn_forward(x_tokens, word_embeddings,
                     w1, b1, w2, b2, w3, b3, fc_w, fc_b,
                     *, block_b=None, mxu_dtype=jnp.float32):
    """TextCNN forward. x_tokens: (max_sen_len, batch) int32, torchtext layout.

    Conv weights are (K, E, C) == PyTorch Conv1d weight.permute(2, 1, 0);
    fc_w is (3C, O) == PyTorch Linear weight.T.
    """
    # Index with the transposed token matrix so the permute happens inside the
    # gather (no separate full-activation transpose pass in HBM).
    emb = word_embeddings[x_tokens.T]                         # (B, L, E) f32
    B, L, E = emb.shape

    kernel_sizes = (w1.shape[0], w2.shape[0], w3.shape[0])
    C = w1.shape[2]
    O = fc_w.shape[1]

    # Stacked conv weight (E, (K1+K2+K3)*C): columns grouped [branch][tap].
    w_cat = jnp.concatenate(
        [jnp.transpose(w, (1, 0, 2)).reshape(E, w.shape[0] * C)
         for w in (w1, w2, w3)], axis=1)
    b_cat = jnp.concatenate([b1, b2, b3], axis=1)             # (1, 3C)
    T = w_cat.shape[1]

    tb = B if block_b is None else min(block_b, B)
    if B % tb != 0:
        raise ValueError("block_b must divide the batch size")
    grid = (B // tb,)

    kernel = functools.partial(
        fused_textcnn_kernel,
        kernel_sizes=kernel_sizes, num_channels=C, mxu_dtype=mxu_dtype)

    return pl.pallas_call(
        kernel,
        out_shape=jax.ShapeDtypeStruct((B, O), jnp.float32),
        grid_spec=pltpu.PrefetchScalarGridSpec(
            num_scalar_prefetch=0,
            grid=grid,
            in_specs=[
                pl.BlockSpec((tb, L, E), lambda i: (i, 0, 0)),   # emb batch tile
                pl.BlockSpec((E, T), lambda i: (0, 0)),          # stacked conv W
                pl.BlockSpec((1, 3 * C), lambda i: (0, 0)),      # stacked conv b
                pl.BlockSpec((3 * C, O), lambda i: (0, 0)),      # fc W
                pl.BlockSpec((1, O), lambda i: (0, 0)),          # fc b
            ],
            out_specs=pl.BlockSpec((tb, O), lambda i: (i, 0)),
            scratch_shapes=[pltpu.VMEM((tb, L, T), jnp.float32)],
        ),
        compiler_params=pltpu.CompilerParams(
            # Independent batch tiles -> shard across TensorCores (v7x megacore).
            dimension_semantics=("parallel",),
        ),
    )(emb, w_cat, b_cat, fc_w, fc_b)


# ---------------------------------------------------------------------------
# Plain-JAX reference (PyTorch-faithful op order) for correctness checking.
# ---------------------------------------------------------------------------
def reference_forward(x_tokens, word_embeddings,
                      w1, b1, w2, b2, w3, b3, fc_w, fc_b):
    emb = jnp.transpose(word_embeddings[x_tokens], (1, 0, 2))  # (B, L, E)

    def branch(w, b):
        K = w.shape[0]
        l_out = emb.shape[1] - K + 1
        acc = sum(jnp.einsum("ble,ec->blc", emb[:, j:j + l_out, :], w[j])
                  for j in range(K))
        acc = jnp.maximum(acc + b, 0.0)           # conv bias + ReLU
        return jnp.max(acc, axis=1)               # global MaxPool1d

    feat = jnp.concatenate([branch(w1, b1), branch(w2, b2), branch(w3, b3)], 1)
    logits = feat @ fc_w + fc_b
    return jax.nn.softmax(logits, axis=-1)


if __name__ == "__main__":
    # ----- config (small, consistent with the module's __init__) -----
    vocab_size   = 50
    embed_size   = 32
    num_channels = 8
    kernel_sizes = (3, 4, 5)
    max_sen_len  = 16
    output_size  = 4
    batch_size   = 16   # small, but gives a 2-step batch grid to exercise the
                        # parallel batch axis
    block_b      = 8    # per-grid-step batch tile; size per VMEM budget at
                        # realistic shapes (halve for v7x's 64 MiB)

    key = jax.random.PRNGKey(0)
    keys = jax.random.split(key, 10)

    # deterministic synthetic parameters (not a checkpoint load)
    word_embeddings = jax.random.normal(keys[0], (vocab_size, embed_size),
                                        jnp.float32) * 0.1
    w1 = jax.random.normal(keys[1], (kernel_sizes[0], embed_size, num_channels),
                           jnp.float32) * 0.1
    b1 = jax.random.normal(keys[2], (1, num_channels), jnp.float32) * 0.1
    w2 = jax.random.normal(keys[3], (kernel_sizes[1], embed_size, num_channels),
                           jnp.float32) * 0.1
    b2 = jax.random.normal(keys[4], (1, num_channels), jnp.float32) * 0.1
    w3 = jax.random.normal(keys[5], (kernel_sizes[2], embed_size, num_channels),
                           jnp.float32) * 0.1
    b3 = jax.random.normal(keys[6], (1, num_channels), jnp.float32) * 0.1
    fc_w = jax.random.normal(keys[7],
                             (num_channels * len(kernel_sizes), output_size),
                             jnp.float32) * 0.1
    fc_b = jax.random.normal(keys[8], (1, output_size), jnp.float32) * 0.1

    # input tokens: (max_sen_len, batch) like torchtext batch.text
    x_tokens = jax.random.randint(keys[9], (max_sen_len, batch_size),
                                  0, vocab_size, dtype=jnp.int32)

    out = text_cnn_forward(x_tokens, word_embeddings,
                           w1, b1, w2, b2, w3, b3, fc_w, fc_b,
                           block_b=block_b)
    out = jax.block_until_ready(out)

    ref = reference_forward(x_tokens, word_embeddings,
                            w1, b1, w2, b2, w3, b3, fc_w, fc_b)

    assert out.shape == (batch_size, output_size)
    # approx-reciprocal softmax denominator -> compare at a few-1e-3 tolerance
    assert jnp.allclose(out, ref, atol=5e-3, rtol=0.0), \
        float(jnp.max(jnp.abs(out - ref)))
    assert jnp.allclose(jnp.sum(out, axis=-1), 1.0, atol=5e-3)
    print("KERNEL_OK")
</pallas_src>

<mosaic_0001>
module attributes {stable_mosaic.version = 11 : i64} {
  func.func @fused_textcnn_kernel(%arg0: i32, %arg1: memref<8x16x32xf32, #tpu.memory_space<vmem>>, %arg2: memref<32x96xf32, #tpu.memory_space<vmem>>, %arg3: memref<1x24xf32, #tpu.memory_space<vmem>>, %arg4: memref<24x4xf32, #tpu.memory_space<vmem>>, %arg5: memref<1x4xf32, #tpu.memory_space<vmem>>, %arg6: memref<8x4xf32, #tpu.memory_space<vmem>>, %arg7: memref<8x16x96xf32, #tpu.memory_space<vmem>>) attributes {dimension_semantics = [#tpu.dimension_semantics<parallel>], iteration_bounds = array<i64: 2>, scalar_prefetch = 0 : i64, scratch_operands = 1 : i64, tpu.core_type = #tpu.core_type<tc>, window_params = [{transform_indices = @transform_0, window_bounds = array<i64: 8, 16, 32>}, {pipeline_mode = #tpu.pipeline_mode<synchronous>, transform_indices = @transform_1, window_bounds = array<i64: 32, 96>}, {pipeline_mode = #tpu.pipeline_mode<synchronous>, transform_indices = @transform_2, window_bounds = array<i64: 1, 24>}, {pipeline_mode = #tpu.pipeline_mode<synchronous>, transform_indices = @transform_3, window_bounds = array<i64: 24, 4>}, {pipeline_mode = #tpu.pipeline_mode<synchronous>, transform_indices = @transform_4, window_bounds = array<i64: 1, 4>}, {transform_indices = @transform_5, window_bounds = array<i64: 8, 4>}]} {
    %c0 = arith.constant 0 : index
    %c0_0 = arith.constant 0 : index
    %c0_1 = arith.constant 0 : index
    %0 = vector.load %arg1[%c0, %c0_0, %c0_1] : memref<8x16x32xf32, #tpu.memory_space<vmem>>, vector<8x16x32xf32>
    %1 = vector.shape_cast %0 : vector<8x16x32xf32> to vector<128x32xf32>
    %c0_2 = arith.constant 0 : index
    %c0_3 = arith.constant 0 : index
    %2 = vector.load %arg2[%c0_2, %c0_3] : memref<32x96xf32, #tpu.memory_space<vmem>>, vector<32x96xf32>
    %cst = arith.constant dense<0.000000e+00> : vector<128x96xf32>
    %3 = tpu.matmul %1, %2, %cst {dimension_numbers = #tpu.dot_dimension_numbers<[1], [0], [0], [1], [0, 0, 1, 1], [], []>} : vector<128x32xf32>, vector<32x96xf32>, vector<128x96xf32> -> vector<128x96xf32>
    %4 = vector.shape_cast %3 : vector<128x96xf32> to vector<8x16x96xf32>
    %c0_4 = arith.constant 0 : index
    %c0_5 = arith.constant 0 : index
    %c0_6 = arith.constant 0 : index
    %5 = vector.load %arg7[%c0_4, %c0_5, %c0_6] : memref<8x16x96xf32, #tpu.memory_space<vmem>>, vector<8x16x96xf32>
    tpu.vector_store %arg7[%c0_4, %c0_5, %c0_6], %4 {strides = array<i32>} : memref<8x16x96xf32, #tpu.memory_space<vmem>>, vector<8x16x96xf32>,
    %c0_7 = arith.constant 0 : index
    %c0_8 = arith.constant 0 : index
    %c0_9 = arith.constant 0 : index
    %6 = vector.load %arg7[%c0_7, %c0_8, %c0_9] : memref<8x16x96xf32, #tpu.memory_space<vmem>>, vector<8x14x8xf32>
    %c0_10 = arith.constant 0 : index
    %c1 = arith.constant 1 : index
    %c8 = arith.constant 8 : index
    %7 = vector.load %arg7[%c0_10, %c1, %c8] : memref<8x16x96xf32, #tpu.memory_space<vmem>>, vector<8x14x8xf32>
    %8 = arith.addf %6, %7 : vector<8x14x8xf32>
    %c0_11 = arith.constant 0 : index
    %c2 = arith.constant 2 : index
    %c16 = arith.constant 16 : index
    %9 = vector.load %arg7[%c0_11, %c2, %c16] : memref<8x16x96xf32, #tpu.memory_space<vmem>>, vector<8x14x8xf32>
    %10 = arith.addf %8, %9 : vector<8x14x8xf32>
    %cst_12 = arith.constant dense<0xFF800000> : vector<8x8xf32>
    %11 = vector.multi_reduction <maximumf>, %10, %cst_12 [1] : vector<8x14x8xf32> to vector<8x8xf32>
    %c0_13 = arith.constant 0 : index
    %c0_14 = arith.constant 0 : index
    %c24 = arith.constant 24 : index
    %12 = vector.load %arg7[%c0_13, %c0_14, %c24] : memref<8x16x96xf32, #tpu.memory_space<vmem>>, vector<8x13x8xf32>
    %c0_15 = arith.constant 0 : index
    %c1_16 = arith.constant 1 : index
    %c32 = arith.constant 32 : index
    %13 = vector.load %arg7[%c0_15, %c1_16, %c32] : memref<8x16x96xf32, #tpu.memory_space<vmem>>, vector<8x13x8xf32>
    %14 = arith.addf %12, %13 : vector<8x13x8xf32>
    %c0_17 = arith.constant 0 : index
    %c2_18 = arith.constant 2 : index
    %c40 = arith.constant 40 : index
    %15 = vector.load %arg7[%c0_17, %c2_18, %c40] : memref<8x16x96xf32, #tpu.memory_space<vmem>>, vector<8x13x8xf32>
    %16 = arith.addf %14, %15 : vector<8x13x8xf32>
    %c0_19 = arith.constant 0 : index
    %c3 = arith.constant 3 : index
    %c48 = arith.constant 48 : index
    %17 = vector.load %arg7[%c0_19, %c3, %c48] : memref<8x16x96xf32, #tpu.memory_space<vmem>>, vector<8x13x8xf32>
    %18 = arith.addf %16, %17 : vector<8x13x8xf32>
    %cst_20 = arith.constant dense<0xFF800000> : vector<8x8xf32>
    %19 = vector.multi_reduction <maximumf>, %18, %cst_20 [1] : vector<8x13x8xf32> to vector<8x8xf32>
    %c0_21 = arith.constant 0 : index
    %c0_22 = arith.constant 0 : index
    %c56 = arith.constant 56 : index
    %20 = vector.load %arg7[%c0_21, %c0_22, %c56] : memref<8x16x96xf32, #tpu.memory_space<vmem>>, vector<8x12x8xf32>
    %c0_23 = arith.constant 0 : index
    %c1_24 = arith.constant 1 : index
    %c64 = arith.constant 64 : index
    %21 = vector.load %arg7[%c0_23, %c1_24, %c64] : memref<8x16x96xf32, #tpu.memory_space<vmem>>, vector<8x12x8xf32>
    %22 = arith.addf %20, %21 : vector<8x12x8xf32>
    %c0_25 = arith.constant 0 : index
    %c2_26 = arith.constant 2 : index
    %c72 = arith.constant 72 : index
    %23 = vector.load %arg7[%c0_25, %c2_26, %c72] : memref<8x16x96xf32, #tpu.memory_space<vmem>>, vector<8x12x8xf32>
    %24 = arith.addf %22, %23 : vector<8x12x8xf32>
    %c0_27 = arith.constant 0 : index
    %c3_28 = arith.constant 3 : index
    %c80 = arith.constant 80 : index
    %25 = vector.load %arg7[%c0_27, %c3_28, %c80] : memref<8x16x96xf32, #tpu.memory_space<vmem>>, vector<8x12x8xf32>
    %26 = arith.addf %24, %25 : vector<8x12x8xf32>
    %c0_29 = arith.constant 0 : index
    %c4 = arith.constant 4 : index
    %c88 = arith.constant 88 : index
    %27 = vector.load %arg7[%c0_29, %c4, %c88] : memref<8x16x96xf32, #tpu.memory_space<vmem>>, vector<8x12x8xf32>
    %28 = arith.addf %26, %27 : vector<8x12x8xf32>
    %cst_30 = arith.constant dense<0xFF800000> : vector<8x8xf32>
    %29 = vector.multi_reduction <maximumf>, %28, %cst_30 [1] : vector<8x12x8xf32> to vector<8x8xf32>
    %30 = tpu.concatenate %11, %19, %29 in 1 : vector<8x8xf32>, vector<8x8xf32>, vector<8x8xf32> -> vector<8x24xf32>
    %c0_31 = arith.constant 0 : index
    %c0_32 = arith.constant 0 : index
    %31 = vector.load %arg3[%c0_31, %c0_32] : memref<1x24xf32, #tpu.memory_space<vmem>>, vector<1x24xf32>
    %32 = vector.broadcast %31 : vector<1x24xf32> to vector<8x24xf32>
    %33 = arith.addf %30, %32 : vector<8x24xf32>
    %cst_33 = arith.constant 0.000000e+00 : f32
    %34 = vector.broadcast %cst_33 : f32 to vector<8x24xf32>
    %35 = arith.maximumf %33, %34 : vector<8x24xf32>
    %c0_34 = arith.constant 0 : index
    %c0_35 = arith.constant 0 : index
    %36 = vector.load %arg4[%c0_34, %c0_35] : memref<24x4xf32, #tpu.memory_space<vmem>>, vector<24x4xf32>
    %cst_36 = arith.constant dense<0.000000e+00> : vector<8x4xf32>
    %37 = tpu.matmul %35, %36, %cst_36 {dimension_numbers = #tpu.dot_dimension_numbers<[1], [0], [0], [1], [0, 0, 1, 1], [], []>} : vector<8x24xf32>, vector<24x4xf32>, vector<8x4xf32> -> vector<8x4xf32>
    %c0_37 = arith.constant 0 : index
    %c0_38 = arith.constant 0 : index
    %38 = vector.load %arg5[%c0_37, %c0_38] : memref<1x4xf32, #tpu.memory_space<vmem>>, vector<1x4xf32>
    %39 = vector.broadcast %38 : vector<1x4xf32> to vector<8x4xf32>
    %40 = arith.addf %37, %39 : vector<8x4xf32>
    %cst_39 = arith.constant dense<0xFF800000> : vector<8xf32>
    %41 = vector.multi_reduction <maximumf>, %40, %cst_39 [1] : vector<8x4xf32> to vector<8xf32>
    %42 = vector.shape_cast %41 : vector<8xf32> to vector<8x1xf32>
    %43 = vector.broadcast %42 : vector<8x1xf32> to vector<8x4xf32>
    %44 = arith.subf %40, %43 : vector<8x4xf32>
    %45 = math.exp %44 : vector<8x4xf32>
    %cst_40 = arith.constant dense<0.000000e+00> : vector<8xf32>
    %46 = vector.multi_reduction <add>, %45, %cst_40 [1] : vector<8x4xf32> to vector<8xf32>
    %47 = vector.shape_cast %46 : vector<8xf32> to vector<8x1xf32>
    %48 = tpu.reciprocal %47 {approx = true} : vector<8x1xf32> -> vector<8x1xf32>
    %49 = vector.broadcast %48 : vector<8x1xf32> to vector<8x4xf32>
    %50 = arith.mulf %45, %49 : vector<8x4xf32>
    %c0_41 = arith.constant 0 : index
    %c0_42 = arith.constant 0 : index
    %51 = vector.load %arg6[%c0_41, %c0_42] : memref<8x4xf32, #tpu.memory_space<vmem>>, vector<8x4xf32>
    tpu.vector_store %arg6[%c0_41, %c0_42], %50 {strides = array<i32>} : memref<8x4xf32, #tpu.memory_space<vmem>>, vector<8x4xf32>,
    return
  }
  func.func @transform_0(%arg0: i32) -> (i32, i32, i32) {
    %c0_i32 = arith.constant 0 : i32
    %c0_i32_0 = arith.constant 0 : i32
    %c0_i32_1 = arith.constant 0 : i32
    return %arg0, %c0_i32, %c0_i32_0 : i32, i32, i32
  }
  func.func @transform_1(%arg0: i32) -> (i32, i32) {
    %c0_i32 = arith.constant 0 : i32
    %c0_i32_0 = arith.constant 0 : i32
    %c0_i32_1 = arith.constant 0 : i32
    return %c0_i32, %c0_i32_0 : i32, i32
  }
  func.func @transform_2(%arg0: i32) -> (i32, i32) {
    %c0_i32 = arith.constant 0 : i32
    %c0_i32_0 = arith.constant 0 : i32
    %c0_i32_1 = arith.constant 0 : i32
    return %c0_i32, %c0_i32_0 : i32, i32
  }
  func.func @transform_3(%arg0: i32) -> (i32, i32) {
    %c0_i32 = arith.constant 0 : i32
    %c0_i32_0 = arith.constant 0 : i32
    %c0_i32_1 = arith.constant 0 : i32
    return %c0_i32, %c0_i32_0 : i32, i32
  }
  func.func @transform_4(%arg0: i32) -> (i32, i32) {
    %c0_i32 = arith.constant 0 : i32
    %c0_i32_0 = arith.constant 0 : i32
    %c0_i32_1 = arith.constant 0 : i32
    return %c0_i32, %c0_i32_0 : i32, i32
  }
  func.func @transform_5(%arg0: i32) -> (i32, i32) {
    %c0_i32 = arith.constant 0 : i32
    %c0_i32_0 = arith.constant 0 : i32
    return %arg0, %c0_i32 : i32, i32
  }
}

</mosaic_0001>

<bundles_post_ra>
// kernel: text_cnn_forward.1
= control target key start
LH: loop header
LB: loop body
LE: loop exit
PB: predicated region body
PF: predicated region fallthrough
CT: control target
= control target key end

     0   :  { %s1735_s18 = smov 0   ;;  %s2120_s0 = inlined_call_operand.vmem [shape: f32[16,16,32], index: 0, kind: input, shape index: {}]   ;;  %s2121_s1 = inlined_call_operand.vmem [shape: f32[32,96], index: 1, kind: input, shape index: {}]   ;;  %s2122_s2 = inlined_call_operand.vmem [shape: f32[1,24], index: 2, kind: input, shape index: {}]   ;;  %s2123_s3 = inlined_call_operand.vmem [shape: f32[24,4], index: 3, kind: input, shape index: {}]   ;;  %s2124_s4 = inlined_call_operand.vmem [shape: f32[1,4], index: 4, kind: input, shape index: {}]   ;;  %s2125_s5 = inlined_call_operand.vmem [shape: f32[16,4], index: 5, kind: output, shape index: {}]  }
   0x1 LB: > { %s1741_s19 = sadd.s32 4294967295, %s1695_s18   ;;  %p1562_p0 = scmp.ge.s32.totalorder %s1695_s18, 1  ;;  %s1695_s18 = sphi %s1735_s18, %s15_s18  }
   0x2   : > { %p189_p1 = scmp.lt.s32.totalorder %s1695_s18, 3 }
   0x4   : > { %p190_p2 = pnand %p1562_p0, %p189_p1 }
   0x5   : > { %v244_v0 = vld [vmem:[%s2121_s1] sm:$0xff] (!%p190_p2)  ;;  %v245_v1 = vld [vmem:[%s2121_s1 + $0x8] sm:$0xff] (!%p190_p2)  ;;  %v246_v2 = vld [vmem:[%s2121_s1 + $0x10] sm:$0xff] (!%p190_p2)  ;;  %s1563_s26 = sshll.u32 (!%p190_p2), %s1741_s19, 3  ;;  %vm248_vm0 = vcmask (!%p190_p2), 261120   ;;  %vm442_vm1 = vcmask (!%p190_p2), 785408  }
   0x6   : > { %193 = sbr.rel (%p190_p2) target bundleno = 1193 (0x4a9), region = 40  ;;  %v1654_v3 = vpack.c.bf16 (!%p190_p2), %v245_v1, %v244_v0  ;;  %v247_v4 = vld [vmem:[%s2121_s1 + $0x18] sm:$0xff] (!%p190_p2)  ;;  %p218_p3 = scmp.lt.s32.totalorder (!%p190_p2), %s1563_s26, 15  ;;  %vm1265_vm2 = vcmask (!%p190_p2), 519616   ;;  %vm1263_vm3 = vcmask (!%p190_p2), 523712   ;;  %vm943_vm4 = vcmask (!%p190_p2), 258240  }
   0x7   : > { %v1658_v5 = vpack.c.bf16 (!%p190_p2), %v247_v4, %v246_v2  ;;  %s1697_s8 = smov (!%p190_p2), 120   ;;  %s1698_s9 = smov (!%p190_p2), 112   ;;  %vm941_vm5 = vcmask (!%p190_p2), 261312   ;;  %vm1345_vm6 = vcmask (!%p190_p2), 1041409   ;;  %vm1347_vm7 = vcmask (!%p190_p2), 1042434  }
   0x8   : > { %1655 = vmatprep.subr.bf16.mxu0 (!%p190_p2), %v1654_v3  ;;  %1665 = vmatprep.subr.bf16.mxu1 (!%p190_p2), %v1654_v3  ;;  %s1699_s10 = smov (!%p190_p2), 104   ;;  %s1700_s11 = smov (!%p190_p2), 96   ;;  %vm667_vm8 = vcmask (!%p190_p2), 64512   ;;  %vm1349_vm9 = vcmask (!%p190_p2), 1043459   ;;  %vm669_vm10 = vcmask (!%p190_p2), 62464   ;;  %vm1351_vm11 = vcmask (!%p190_p2), 1044484  }
   0x9   : > { %1657 = vmatpush3.bf16.msra.mxu0 (!%p190_p2), %v1654_v3  ;;  %1667 = vmatpush3.bf16.msra.mxu1 (!%p190_p2), %v1654_v3  ;;  %vm1353_vm12 = vcmask (!%p190_p2), 1045509   ;;  %vm1355_vm13 = vcmask (!%p190_p2), 1046534   ;;  %vm1357_vm14 = vcmask (!%p190_p2), 1047559   ;;  %vm1703_vm15 = vmmov (!%p190_p2), 0   ;;  %s1704_s20 = smov (!%p190_p2), 88   ;;  %p224_p4 = scmp.lt.s32.totalorder (!%p190_p2), %s1741_s19, 1 }
   0xa   : > { %1659 = vmatprep.subr.bf16.mxu0 (!%p190_p2), %v1658_v5  ;;  %1666 = vmatprep.subr.bf16.mxu1 (!%p190_p2), %v1658_v5 }
   0xd   : > { %s2127_s26 = smov (!%p218_p3, %s1563_s26), 15  ;;  %1661 = vmatpush3.bf16.msra.mxu0 %v1658_v5  ;;  %1668 = vmatpush3.bf16.msra.mxu1 %v1658_v5  ;;  %s2129_s19 = smov (!%p224_p4, %s1741_s19), 1 }
   0xe   : > { %s1588_s29 = sshll.u32 %s2127_s26, 4  ;;  %s1566_s25 = sshll.u32 %s2129_s19, 3 }
   0xf   : > { %s1761_s7 = scalar_lea.vmem %s2120_s0, %s1588_s29  ;;  %s227_s28 = scalar_lea.vmem %s2125_s5, %s1566_s25 }
  0x10   : > { %v228_v6 = vld [vmem:[%s1761_s7] sm:$0xff]  ;;  %v238_v7 = vld [vmem:[%s1761_s7 + $0x50] sm:$0xff]  ;;  %v229_v8 = vld [vmem:[%s1761_s7 + $0x8] sm:$0xff] }
  0x11   : > { %1621 = vmatprep.mubr.msk.f32.mxu0 %vm248_vm0, %v228_v6  ;;  %1636 = vmatprep.mubr.msk.f32.mxu1 %vm248_vm0, %v238_v7  ;;  %v239_v9 = vld [vmem:[%s1761_s7 + $0x58] sm:$0xff]  ;;  %v230_v10 = vld [vmem:[%s1761_s7 + $0x10] sm:$0xff]  ;;  %v240_v11 = vld [vmem:[%s1761_s7 + $0x60] sm:$0xff] }
  0x12   : > { %1622 = vmatmul.mubr.msk.f32.vlgmr.msra.gmra.mrb[0].mxu0 %vm248_vm0, %v229_v8  ;;  %1637 = vmatmul.mubr.msk.f32.vlgmr.msra.gmra.mrb[0].mxu1 %vm248_vm0, %v239_v9  ;;  %v231_v12 = vld [vmem:[%s1761_s7 + $0x18] sm:$0xff]  ;;  %v241_v13 = vld [vmem:[%s1761_s7 + $0x68] sm:$0xff]  ;;  %v232_v14 = vld [vmem:[%s1761_s7 + $0x20] sm:$0xff] }
  0x13   : > { %1624 = vmatprep.mubr.msk.f32.mxu0 %vm248_vm0, %v230_v10  ;;  %1639 = vmatprep.mubr.msk.f32.mxu1 %vm248_vm0, %v240_v11  ;;  %v242_v15 = vld [vmem:[%s1761_s7 + $0x70] sm:$0xff]  ;;  %v233_v16 = vld [vmem:[%s1761_s7 + $0x28] sm:$0xff]  ;;  %v243_v17 = vld [vmem:[%s1761_s7 + $0x78] sm:$0xff] }
  0x14   : > { %v234_v18 = vld [vmem:[%s1761_s7 + $0x30] sm:$0xff]  ;;  %v235_v19 = vld [vmem:[%s1761_s7 + $0x38] sm:$0xff]  ;;  %v236_v20 = vld [vmem:[%s1761_s7 + $0x40] sm:$0xff] }
  0x15   : > { %v237_v21 = vld [vmem:[%s1761_s7 + $0x48] sm:$0xff] }
  0x16   : > { %1625 = vmatmul.mubr.msk.f32.gmra.mrb[2].mxu0 %vm248_vm0, %v231_v12  ;;  %1640 = vmatmul.mubr.msk.f32.gmra.mrb[2].mxu1 %vm248_vm0, %v241_v13 }
  0x17   : > { %1627 = vmatprep.mubr.msk.f32.mxu0 %vm248_vm0, %v232_v14  ;;  %1642 = vmatprep.mubr.msk.f32.mxu1 %vm248_vm0, %v242_v15 }
  0x1a   : > { %1628 = vmatmul.mubr.msk.f32.gmra.mrb[4].mxu0 %vm248_vm0, %v233_v16  ;;  %1643 = vmatmul.mubr.msk.f32.gmra.mrb[4].mxu1 %vm248_vm0, %v243_v17 }
  0x1b   : > { %1630 = vmatprep.mubr.msk.f32.mxu0 %vm248_vm0, %v234_v18 }
  0x1e   : > { %1631 = vmatmul.mubr.msk.f32.gmra.mrb[6].mxu0 %vm248_vm0, %v235_v19 }
  0x1f   : > { %1633 = vmatprep.mubr.msk.f32.mxu0 %vm248_vm0, %v236_v20 }
  0x22   : > { %1634 = vmatmul.mubr.msk.f32.gmra.mrb[8].mxu0 %vm248_vm0, %v237_v21  ;;  %vm1397_vm0 = vcmask 130048  }
  0xe5   : > { %v1623_v22 = vpop.f32.mrb[0].mxu0  ;;  %v1638_v24 = vpop.f32.mrb[0].mxu1 }
  0xe6   : > { %444 = vst.msk [vmem:[#allocation2 + $0x8] sm:$0xff] %vm442_vm1, %v1623_v22  ;;  %v363_v23 = vpop.f32.mrb[1].mxu0  ;;  %454 = vst.msk [vmem:[#allocation2 + $0x58] sm:$0xff] %vm442_vm1, %v1638_v24  ;;  %v413_v25 = vpop.f32.mrb[1].mxu1 }
  0xe7   : > { %443 = vst.msk [vmem:[#allocation2] sm:$0xff] %vm442_vm1, %v363_v23  ;;  %453 = vst.msk [vmem:[#allocation2 + $0x50] sm:$0xff] %vm442_vm1, %v413_v25 }
  0xe9   : > { %v1626_v26 = vpop.f32.mrb[2].mxu0  ;;  %v1641_v28 = vpop.f32.mrb[2].mxu1 }
  0xea   : > { %446 = vst.msk [vmem:[#allocation2 + $0x18] sm:$0xff] %vm442_vm1, %v1626_v26  ;;  %v373_v27 = vpop.f32.mrb[3].mxu0  ;;  %456 = vst.msk [vmem:[#allocation2 + $0x68] sm:$0xff] %vm442_vm1, %v1641_v28  ;;  %v423_v29 = vpop.f32.mrb[3].mxu1 }
  0xeb   : > { %445 = vst.msk [vmem:[#allocation2 + $0x10] sm:$0xff] %vm442_vm1, %v373_v27  ;;  %455 = vst.msk [vmem:[#allocation2 + $0x60] sm:$0xff] %vm442_vm1, %v423_v29 }
  0xed   : > { %v1023_v30 = vld [vmem:[#allocation2 + $0x9] sm:$0xf]  ;;  %v1028_v32 = vld [vmem:[#allocation2 + $0x59] sm:$0xf]  ;;  %v1629_v34 = vpop.f32.mrb[4].mxu0  ;;  %v1644_v36 = vpop.f32.mrb[4].mxu1 }
  0xee   : > { %v797_v31 = vld [vmem:[#allocation2 + $0xa] sm:$0x1f]  ;;  %1039 = vrot.lane.b32.xlu1 %v1023_v30, %s1697_s8  ;;  %448 = vst.msk [vmem:[#allocation2 + $0x28] sm:$0xff] %vm442_vm1, %v1629_v34  ;;  %v383_v35 = vpop.f32.mrb[5].mxu0  ;;  %458 = vst.msk [vmem:[#allocation2 + $0x78] sm:$0xff] %vm442_vm1, %v1644_v36  ;;  %v433_v37 = vpop.f32.mrb[5].mxu1 }
  0xef   : > { %813 = vrot.lane.b32.xlu0 %v797_v31, %s1698_s9  ;;  %v749_v33 = vld [vmem:[#allocation2 + $0x9] sm:$0x1f]  ;;  %447 = vst.msk [vmem:[#allocation2 + $0x20] sm:$0xff] %vm442_vm1, %v383_v35  ;;  %457 = vst.msk [vmem:[#allocation2 + $0x70] sm:$0xff] %vm442_vm1, %v433_v37  ;;  %v754_v43 = vld [vmem:[#allocation2 + $0x59] sm:$0x1f] }
  0xf0   : > { %v1119_v40 = vld [vmem:[#allocation2 + $0xb] sm:$0xf]  ;;  %v1076_v44 = vld [vmem:[#allocation2 + $0x5a] sm:$0xf]  ;;  %v571_v52 = vld [vmem:[#allocation2 + $0x2] sm:$0xff] }
  0xf1   : > { %v1632_v38 = vpop.f32.mrb[6].mxu0  ;;  %v1071_v41 = vld [vmem:[#allocation2 + $0xa] sm:$0xf]  ;;  %v802_v47 = vld [vmem:[#allocation2 + $0x5a] sm:$0x1f]  ;;  %v475_v53 = vld [vmem:[#allocation2 + $0x1] sm:$0xff] }
  0xf2   : > { %765 = vrot.lane.b32.xlu1 %v749_v33, %s1697_s8  ;;  %450 = vst.msk [vmem:[#allocation2 + $0x38] sm:$0xff] %vm442_vm1, %v1632_v38  ;;  %v393_v39 = vpop.f32.mrb[7].mxu0  ;;  %v846_v46 = vld [vmem:[#allocation2 + $0xb] sm:$0x1f]  ;;  %v1124_v49 = vld [vmem:[#allocation2 + $0x5b] sm:$0xf] }
  0xf3   : > { %1049 = vrot.lane.b32.xlu0 %v1028_v32, %s1697_s8  ;;  %449 = vst.msk [vmem:[#allocation2 + $0x30] sm:$0xff] %vm442_vm1, %v393_v39  ;;  %v1168_v48 = vld [vmem:[#allocation2 + $0xc] sm:$0xf]  ;;  %v1178_v50 = vld [vmem:[#allocation2 + $0x5c] sm:$0xf]  ;;  %v581_v54 = vld [vmem:[#allocation2 + $0x52] sm:$0xff] }
  0xf4   : > { %v856_v51 = vld [vmem:[#allocation2 + $0x5b] sm:$0x1f]  ;;  %v485_v55 = vld [vmem:[#allocation2 + $0x51] sm:$0xff]  ;;  %v1167_v56 = vld [vmem:[#allocation2 + $0x4] sm:$0xff] }
  0xf5   : > { %v1635_v42 = vpop.f32.mrb[8].mxu0  ;;  %v845_v57 = vld [vmem:[#allocation2 + $0x3] sm:$0xff]  ;;  %v750_v58 = vld [vmem:[#allocation2 + $0x19] sm:$0x1f]  ;;  %v858_v5 = vld [vmem:[#allocation2 + $0x6b] sm:$0x1f] }
  0xf6   : > { %1087 = vrot.lane.b32.xlu1 %v1071_v41, %s1698_s9  ;;  %452 = vst.msk [vmem:[#allocation2 + $0x48] sm:$0xff] %vm442_vm1, %v1635_v42  ;;  %v403_v45 = vpop.f32.mrb[9].mxu0  ;;  %v855_v59 = vld [vmem:[#allocation2 + $0x53] sm:$0xff]  ;;  %v755_v62 = vld [vmem:[#allocation2 + $0x69] sm:$0x1f]  ;;  %v487_v11 = vld [vmem:[#allocation2 + $0x61] sm:$0xff] }
  0xf7   : > { %1135 = vrot.lane.b32.xlu0 %v1119_v40, %s1699_s10  ;;  %451 = vst.msk [vmem:[#allocation2 + $0x40] sm:$0xff] %vm442_vm1, %v403_v45  ;;  %v1177_v60 = vld [vmem:[#allocation2 + $0x54] sm:$0xff]  ;;  %v1170_v1 = vld [vmem:[#allocation2 + $0x1c] sm:$0xf]  ;;  %v1077_v3 = vld [vmem:[#allocation2 + $0x6a] sm:$0xf] }
  0xf8   : > { %v1072_v61 = vld [vmem:[#allocation2 + $0x1a] sm:$0xf]  ;;  %v1029_v6 = vld [vmem:[#allocation2 + $0x69] sm:$0xf]  ;;  %v477_v7 = vld [vmem:[#allocation2 + $0x11] sm:$0xff]  ;;  %vm1418_vm1 = vcmask 195584  }
  0xf9   : > { %v1024_v63 = vld [vmem:[#allocation2 + $0x19] sm:$0xf]  ;;  %v803_v8 = vld [vmem:[#allocation2 + $0x6a] sm:$0x1f]  ;;  %v583_v17 = vld [vmem:[#allocation2 + $0x62] sm:$0xff] }
  0xfa   : > { %1097 = vrot.lane.b32.xlu1 %v1076_v44, %s1698_s9  ;;  %v798_v0 = vld [vmem:[#allocation2 + $0x1a] sm:$0x1f]  ;;  %v573_v9 = vld [vmem:[#allocation2 + $0x12] sm:$0xff]  ;;  %v1125_v10 = vld [vmem:[#allocation2 + $0x6b] sm:$0xf] }
  0xfb   : > { %775 = vrot.lane.b32.xlu0 %v754_v43, %s1697_s8  ;;  %v1120_v2 = vld [vmem:[#allocation2 + $0x1b] sm:$0xf]  ;;  %v847_v12 = vld [vmem:[#allocation2 + $0x13] sm:$0xff]  ;;  %v857_v13 = vld [vmem:[#allocation2 + $0x63] sm:$0xff] }
  0xfc   : > { %v848_v4 = vld [vmem:[#allocation2 + $0x1b] sm:$0x1f]  ;;  %v1179_v15 = vld [vmem:[#allocation2 + $0x64] sm:$0xff]  ;;  %v1172_v28 = vld [vmem:[#allocation2 + $0x2c] sm:$0xf] }
  0xfd   : > { %v1169_v14 = vld [vmem:[#allocation2 + $0x14] sm:$0xff]  ;;  %v850_v16 = vld [vmem:[#allocation2 + $0x2b] sm:$0x1f]  ;;  %v479_v29 = vld [vmem:[#allocation2 + $0x21] sm:$0xff] }
  0xfe   : > { %823 = vrot.lane.b32.xlu1 %v802_v47, %s1698_s9  ;;  %v1030_v18 = vld [vmem:[#allocation2 + $0x79] sm:$0xf]  ;;  %v1025_v19 = vld [vmem:[#allocation2 + $0x29] sm:$0xf]  ;;  %v489_v39 = vld [vmem:[#allocation2 + $0x71] sm:$0xff] }
  0xff   : > { %879 = vrot.lane.b32.xlu0 %v846_v46, %s1699_s10  ;;  %v756_v20 = vld [vmem:[#allocation2 + $0x79] sm:$0x1f]  ;;  %v751_v21 = vld [vmem:[#allocation2 + $0x29] sm:$0x1f] }
 0x100   : > { %v1078_v22 = vld [vmem:[#allocation2 + $0x7a] sm:$0xf]  ;;  %v1073_v23 = vld [vmem:[#allocation2 + $0x2a] sm:$0xf]  ;;  %v575_v31 = vld [vmem:[#allocation2 + $0x22] sm:$0xff] }
 0x101   : > { %v804_v24 = vld [vmem:[#allocation2 + $0x7a] sm:$0x1f]  ;;  %v799_v25 = vld [vmem:[#allocation2 + $0x2a] sm:$0x1f]  ;;  %v585_v46 = vld [vmem:[#allocation2 + $0x72] sm:$0xff] }
 0x102   : > { %1145 = vrot.lane.b32.xlu1 %v1124_v49, %s1699_s10  ;;  %v1126_v26 = vld [vmem:[#allocation2 + $0x7b] sm:$0xf]  ;;  %v1121_v27 = vld [vmem:[#allocation2 + $0x2b] sm:$0xf]  ;;  %v859_v34 = vld [vmem:[#allocation2 + $0x73] sm:$0xff] }
 0x103   : > { %1201 = vrot.lane.b32.xlu0 %v1168_v48, %s1700_s11  ;;  %v860_v30 = vld [vmem:[#allocation2 + $0x7b] sm:$0x1f]  ;;  %v849_v35 = vld [vmem:[#allocation2 + $0x23] sm:$0xff] }
 0x104   : > { %v752_v36 = vld [vmem:[#allocation2 + $0x39] sm:$0x1f]  ;;  %v1171_v42 = vld [vmem:[#allocation2 + $0x24] sm:$0xff] }
 0x105   : > { %v1074_v43 = vld [vmem:[#allocation2 + $0x3a] sm:$0xf] }
 0x106   : > { %899 = vrot.lane.b32.xlu1 %v856_v51, %s1699_s10  ;;  %v800_v47 = vld [vmem:[#allocation2 + $0x3a] sm:$0x1f] }
 0x107   : > { %1221 = vrot.lane.b32.xlu0 %v1178_v50, %s1700_s11  ;;  %v1026_v50 = vld [vmem:[#allocation2 + $0x39] sm:$0xf] }
 0x108   : > { %v1174_v51 = vld [vmem:[#allocation2 + $0x3c] sm:$0xf] }
 0x10a   : > { %603 = vrot.lane.b32.xlu1 %v571_v52, %s1698_s9  ;;  %v1020_v52 = vld [vmem:[#allocation2 + $0x58] sm:$0xf] }
 0x10b   : > { %507 = vrot.lane.b32.xlu0 %v475_v53, %s1697_s8 }
 0x10e   : > { %623 = vrot.lane.b32.xlu1 %v581_v54, %s1698_s9 }
 0x10f   : > { %527 = vrot.lane.b32.xlu0 %v485_v55, %s1697_s8 }
 0x112   : > { %1199 = vrot.lane.b32.xlu1 %v1167_v56, %s1700_s11 }
 0x113   : > { %877 = vrot.lane.b32.xlu0 %v845_v57, %s1699_s10  ;;  %v1122_v57 = vld [vmem:[#allocation2 + $0x3b] sm:$0xf] }
 0x116   : > { %897 = vrot.lane.b32.xlu1 %v855_v59, %s1699_s10 }
 0x117   : > { %767 = vrot.lane.b32.xlu0 %v750_v58, %s1697_s8  ;;  %v577_v58 = vld [vmem:[#allocation2 + $0x32] sm:$0xff] }
 0x11a   : > { %1219 = vrot.lane.b32.xlu1 %v1177_v60, %s1700_s11 }
 0x11b   : > { %1089 = vrot.lane.b32.xlu0 %v1072_v61, %s1698_s9 }
 0x11e   : > { %1041 = vrot.lane.b32.xlu1 %v1024_v63, %s1697_s8  ;;  %v852_v63 = vld [vmem:[#allocation2 + $0x3b] sm:$0x1f] }
 0x11f   : > { %777 = vrot.lane.b32.xlu0 %v755_v62, %s1697_s8 }
 0x122   : > { %815 = vrot.lane.b32.xlu1 %v798_v0, %s1698_s9  ;;  %v851_v0 = vld [vmem:[#allocation2 + $0x33] sm:$0xff] }
 0x123   : > { %1205 = vrot.lane.b32.xlu0 %v1170_v1, %s1700_s11  ;;  %v801_v1 = vld [vmem:[#allocation2 + $0x4a] sm:$0x1f] }
 0x126   : > { %1137 = vrot.lane.b32.xlu1 %v1120_v2, %s1699_s10  ;;  %v1015_v2 = vld [vmem:[#allocation2 + $0x8] sm:$0xf] }
 0x127   : > { %1099 = vrot.lane.b32.xlu0 %v1077_v3, %s1698_s9 }
 0x12a   : > { %883 = vrot.lane.b32.xlu1 %v848_v4, %s1699_s10 }
 0x12b   : > { %903 = vrot.lane.b32.xlu0 %v858_v5, %s1699_s10  ;;  %v459_v5 = vld [vmem:[#allocation2] sm:$0xff] }
 0x12e   : > { %1051 = vrot.lane.b32.xlu1 %v1029_v6, %s1697_s8 }
 0x12f   : > { %511 = vrot.lane.b32.xlu0 %v477_v7, %s1697_s8 }
 0x132   : > { %825 = vrot.lane.b32.xlu1 %v803_v8, %s1698_s9  ;;  %v481_v8 = vld [vmem:[#allocation2 + $0x31] sm:$0xff] }
 0x133   : > { %607 = vrot.lane.b32.xlu0 %v573_v9, %s1698_s9 }
 0x136   : > { %1147 = vrot.lane.b32.xlu1 %v1125_v10, %s1699_s10 }
 0x137   : > { %531 = vrot.lane.b32.xlu0 %v487_v11, %s1697_s8 }
 0x13a   : > { %881 = vrot.lane.b32.xlu1 %v847_v12, %s1699_s10  ;;  %v469_v12 = vld [vmem:[#allocation2 + $0x50] sm:$0xff] }
 0x13b   : > { %901 = vrot.lane.b32.xlu0 %v857_v13, %s1699_s10 }
 0x13e   : > { %1203 = vrot.lane.b32.xlu1 %v1169_v14, %s1700_s11 }
 0x13f   : > { %1223 = vrot.lane.b32.xlu0 %v1179_v15, %s1700_s11  ;;  %v1173_v15 = vld [vmem:[#allocation2 + $0x34] sm:$0xff] }
 0x142   : > { %627 = vrot.lane.b32.xlu1 %v583_v17, %s1698_s9  ;;  %v746_v17 = vld [vmem:[#allocation2 + $0x58] sm:$0x1f] }
 0x143   : > { %887 = vrot.lane.b32.xlu0 %v850_v16, %s1699_s10  ;;  %v1123_v16 = vld [vmem:[#allocation2 + $0x4b] sm:$0xf] }
 0x146   : > { %1043 = vrot.lane.b32.xlu1 %v1025_v19, %s1697_s8 }
 0x147   : > { %1053 = vrot.lane.b32.xlu0 %v1030_v18, %s1697_s8 }
 0x14a   : > { %769 = vrot.lane.b32.xlu1 %v751_v21, %s1697_s8 }
 0x14b   : > { %779 = vrot.lane.b32.xlu0 %v756_v20, %s1697_s8 }
 0x14e   : > { %1091 = vrot.lane.b32.xlu1 %v1073_v23, %s1698_s9 }
 0x14f   : > { %1101 = vrot.lane.b32.xlu0 %v1078_v22, %s1698_s9 }
 0x152   : > { %817 = vrot.lane.b32.xlu1 %v799_v25, %s1698_s9 }
 0x153   : > { %827 = vrot.lane.b32.xlu0 %v804_v24, %s1698_s9 }
 0x156   : > { %1139 = vrot.lane.b32.xlu1 %v1121_v27, %s1699_s10  ;;  %v1176_v27 = vld [vmem:[#allocation2 + $0x4c] sm:$0xf] }
 0x157   : > { %1149 = vrot.lane.b32.xlu0 %v1126_v26, %s1699_s10  ;;  %v1027_v26 = vld [vmem:[#allocation2 + $0x49] sm:$0xf] }
 0x15a   : > { %1209 = vrot.lane.b32.xlu1 %v1172_v28, %s1700_s11 }
 0x15b   : > { %515 = vrot.lane.b32.xlu0 %v479_v29, %s1697_s8 }
 0x15e   : > { %907 = vrot.lane.b32.xlu1 %v860_v30, %s1699_s10 }
 0x15f   : > { %611 = vrot.lane.b32.xlu0 %v575_v31, %s1698_s9 }
 0x160   : > { %v1040_v32 = vpop.permute.xlu1 %1039 }
 0x161   : > { %v1869_v33 = vpop.permute.xlu0 %813  ;;  %v1063_v6 = vadd.f32 %v1040_v32, %v1015_v2  ;;  %v741_v2 = vld [vmem:[#allocation2 + $0x8] sm:$0x1f] }
 0x162   : > { %905 = vrot.lane.b32.xlu1 %v859_v34, %s1699_s10 }
 0x163   : > { %885 = vrot.lane.b32.xlu0 %v849_v35, %s1699_s10 }
 0x164   : > { %v1873_v38 = vpop.permute.xlu1 %765 }
 0x165   : > { %v1050_v37 = vpop.permute.xlu0 %1049 }
 0x166   : > { %771 = vrot.lane.b32.xlu1 %v752_v36, %s1697_s8  ;;  %v1068_v53 = vadd.f32 %v1050_v37, %v1020_v52  ;;  %v753_v36 = vld [vmem:[#allocation2 + $0x49] sm:$0x1f]  ;;  %v483_v37 = vld [vmem:[#allocation2 + $0x41] sm:$0xff] }
 0x167   : > { %535 = vrot.lane.b32.xlu0 %v489_v39, %s1697_s8 }
 0x168   : > { %v1088_v41 = vpop.permute.xlu1 %1087 }
 0x169   : > { %v1136_v40 = vpop.permute.xlu0 %1135  ;;  %v1111_v9 = vadd.f32 %v1088_v41, %v1063_v6 }
 0x16a   : > { %1093 = vrot.lane.b32.xlu1 %v1074_v43, %s1698_s9 }
 0x16b   : > { %1207 = vrot.lane.b32.xlu0 %v1171_v42, %s1700_s11  ;;  %v1159_v19 = vadd.f32 %v1136_v40, %v1111_v9 }
 0x16c   : > { %v1098_v45 = vpop.permute.xlu1 %1097 }
 0x16d   : > { %v776_v44 = vpop.permute.xlu0 %775  ;;  %v1116_v56 = vadd.f32 %v1098_v45, %v1068_v53  ;;  %v1016_v53 = vld [vmem:[#allocation2 + $0x18] sm:$0xf] }
 0x16e   : > { %819 = vrot.lane.b32.xlu1 %v800_v47, %s1698_s9  ;;  %v794_v18 = vadd.f32 %v776_v44, %v746_v17  ;;  %v579_v47 = vld [vmem:[#allocation2 + $0x42] sm:$0xff] }
 0x16f   : > { %631 = vrot.lane.b32.xlu0 %v585_v46, %s1698_s9  ;;  %v1075_v46 = vld [vmem:[#allocation2 + $0x4a] sm:$0xf] }
 0x170   : > { %v824_v49 = vpop.permute.xlu1 %823 }
 0x171   : > { %v1881_v48 = vpop.permute.xlu0 %879  ;;  %v842_v23 = vadd.f32 %v824_v49, %v794_v18  ;;  %v1021_v18 = vld [vmem:[#allocation2 + $0x68] sm:$0xf] }
 0x172   : > { %1213 = vrot.lane.b32.xlu1 %v1174_v51, %s1700_s11 }
 0x173   : > { %1045 = vrot.lane.b32.xlu0 %v1026_v50, %s1697_s8 }
 0x174   : > { %v1146_v55 = vpop.permute.xlu1 %1145 }
 0x175   : > { %v1202_v54 = vpop.permute.xlu0 %1201  ;;  %v1164_v59 = vadd.f32 %v1146_v55, %v1116_v56  ;;  %v854_v56 = vld [vmem:[#allocation2 + $0x4b] sm:$0x1f] }
 0x176   : > { %615 = vrot.lane.b32.xlu1 %v577_v58, %s1698_s9  ;;  %v1248_v24 = vadd.f32 %v1202_v54, %v1159_v19  ;;  %v742_v58 = vld [vmem:[#allocation2 + $0x18] sm:$0x1f] }
 0x177   : > { %1141 = vrot.lane.b32.xlu0 %v1122_v57, %s1699_s10  ;;  %v853_v57 = vld [vmem:[#allocation2 + $0x43] sm:$0xff] }
 0x178   : > { %v900_v61 = vpop.permute.xlu1 %899  ;;  %v1266_v32 = vsel %vm1265_vm2, %v1248_v24, -inf }
 0x179   : > { %v1222_v60 = vpop.permute.xlu0 %1221  ;;  %v936_v28 = vadd.f32 %v900_v61, %v842_v23  ;;  %v480_v23 = vld [vmem:[#allocation2 + $0x29] sm:$0x3f] }
 0x17a   : > { %v1887_v62 = vadd.f32 %v1222_v60, %v1164_v59  ;;  %889 = vrot.lane.b32.xlu1 %v851_v0, %s1699_s10  ;;  %v1175_v0 = vld [vmem:[#allocation2 + $0x44] sm:$0xff] }
 0x17b   : > { %891 = vrot.lane.b32.xlu0 %v852_v63, %s1699_s10  ;;  %v989_v40 = vsel %vm943_vm4, %v936_v28, -inf }
 0x17c   : > { %v604_v3 = vpop.permute.xlu1 %603  ;;  %v1311_v49 = vsel %vm1265_vm2, %v1887_v62, -inf }
 0x17d   : > { %v508_v4 = vpop.permute.xlu0 %507 }
 0x17e   : > { %v555_v7 = vadd.f32 %v508_v4, %v459_v5  ;;  %821 = vrot.lane.b32.xlu1 %v801_v1, %s1698_s9  ;;  %v1180_v1 = vld [vmem:[#allocation2 + $0x6c] sm:$0xf] }
 0x17f   : > { %519 = vrot.lane.b32.xlu0 %v481_v8, %s1697_s8  ;;  %v1182_v8 = vld [vmem:[#allocation2 + $0x7c] sm:$0xf] }
 0x180   : > { %v1893_v10 = vadd.f32 %v604_v3, %v555_v7  ;;  %v624_v11 = vpop.permute.xlu1 %623  ;;  %v789_v3 = vadd.f32 %v1873_v38, %v741_v2  ;;  %v1181_v7 = vld [vmem:[#allocation2 + $0x74] sm:$0xff]  ;;  %v471_v2 = vld [vmem:[#allocation2 + $0x60] sm:$0xff] }
 0x181   : > { %v528_v13 = vpop.permute.xlu0 %527 }
 0x182   : > { %v565_v14 = vadd.f32 %v528_v13, %v469_v12  ;;  %1143 = vrot.lane.b32.xlu1 %v1123_v16, %s1699_s10  ;;  %v478_v16 = vld [vmem:[#allocation2 + $0x19] sm:$0x3f] }
 0x183   : > { %1211 = vrot.lane.b32.xlu0 %v1173_v15, %s1700_s11  ;;  %v476_v15 = vld [vmem:[#allocation2 + $0x9] sm:$0x3f] }
 0x184   : > { %v1897_v20 = vadd.f32 %v624_v11, %v565_v14  ;;  %v1200_v21 = vpop.permute.xlu1 %1199  ;;  %v837_v11 = vadd.f32 %v1869_v33, %v789_v3  ;;  %v482_v33 = vld [vmem:[#allocation2 + $0x39] sm:$0x3f] }
 0x185   : > { %v878_v22 = vpop.permute.xlu0 %877 }
 0x186   : > { %v1900_v25 = vadd.f32 %v878_v22, %v1893_v10  ;;  %1217 = vrot.lane.b32.xlu1 %v1176_v27, %s1700_s11  ;;  %v926_v38 = vadd.f32 %v1881_v48, %v837_v11  ;;  %v461_v27 = vld [vmem:[#allocation2 + $0x10] sm:$0xff] }
 0x187   : > { %1047 = vrot.lane.b32.xlu0 %v1027_v26, %s1697_s8  ;;  %v747_v26 = vld [vmem:[#allocation2 + $0x68] sm:$0x1f] }
 0x188   : > { %v1247_v29 = vadd.f32 %v1200_v21, %v1900_v25  ;;  %v898_v30 = vpop.permute.xlu1 %897  ;;  %v942_v17 = vsel %vm941_vm5, %v1900_v25, -inf  ;;  %v944_v24 = vsel %vm943_vm4, %v926_v38, -inf }
 0x189   : > { %v768_v31 = vpop.permute.xlu0 %767  ;;  %v935_v35 = vadd.f32 %v898_v30, %v1897_v20  ;;  %v945_v48 = vmax.f32 %v942_v17, %v944_v24 }
 0x18a   : > { %v1264_v34 = vsel %vm1263_vm3, %v1247_v29, -inf  ;;  %523 = vrot.lane.b32.xlu1 %v483_v37, %s1697_s8  ;;  %v790_v59 = vadd.f32 %v768_v31, %v742_v58 }
 0x18b   : > { %v1908_v39 = vmax.f32 %v1264_v34, %v1266_v32  ;;  %773 = vrot.lane.b32.xlu0 %v753_v36, %s1697_s8  ;;  %v988_v41 = vsel %vm941_vm5, %v935_v35, -inf  ;;  %v574_v36 = vld [vmem:[#allocation2 + $0x1a] sm:$0x3f]  ;;  %v946_v37 = vrot.slane %v945_v48, 4 }
 0x18c   : > { %v1914_v42 = vmax.f32 %v988_v41, %v989_v40  ;;  %v1220_v43 = vpop.permute.xlu1 %1219 }
 0x18d   : > { %v1090_v44 = vpop.permute.xlu0 %1089  ;;  %v1257_v45 = vadd.f32 %v1220_v43, %v935_v35  ;;  %v572_v35 = vld [vmem:[#allocation2 + $0xa] sm:$0x3f] }
 0x18e   : > { %619 = vrot.lane.b32.xlu1 %v579_v47, %s1698_s9  ;;  %v947_v47 = vmax.f32 %v945_v48, %v946_v37  ;;  %v584_v48 = vld [vmem:[#allocation2 + $0x6a] sm:$0x3f] }
 0x18f   : > { %1095 = vrot.lane.b32.xlu0 %v1075_v46, %s1698_s9  ;;  %v1310_v50 = vsel %vm1263_vm3, %v1257_v45, -inf  ;;  %v484_v45 = vld [vmem:[#allocation2 + $0x49] sm:$0x3f] }
 0x190   : > { %v1921_v51 = vmax.f32 %v1310_v50, %v1311_v49  ;;  %v1042_v52 = vpop.permute.xlu1 %1041  ;;  %v576_v46 = vld [vmem:[#allocation2 + $0x2a] sm:$0x3f]  ;;  %v1268_v49 = vrot.slane %v1908_v39, 4 }
 0x191   : > { %v778_v54 = vpop.permute.xlu0 %777  ;;  %v1064_v55 = vadd.f32 %v1042_v52, %v1016_v53 }
 0x192   : > { %893 = vrot.lane.b32.xlu1 %v853_v57, %s1699_s10  ;;  %v795_v28 = vadd.f32 %v778_v54, %v747_v26  ;;  %v486_v54 = vld [vmem:[#allocation2 + $0x59] sm:$0x3f] }
 0x193   : > { %895 = vrot.lane.b32.xlu0 %v854_v56, %s1699_s10  ;;  %v1112_v60 = vadd.f32 %v1090_v44, %v1064_v55  ;;  %v578_v55 = vld [vmem:[#allocation2 + $0x3a] sm:$0x3f]  ;;  %v948_v56 = vrot.slane %v947_v47, 2 }
 0x194   : > { %v816_v61 = vpop.permute.xlu1 %815 }
 0x195   : > { %v1206_v63 = vpop.permute.xlu0 %1205  ;;  %v838_v62 = vadd.f32 %v816_v61, %v790_v59  ;;  %v1269_v59 = vmax.f32 %v1908_v39, %v1268_v49 }
 0x196   : > { %1225 = vrot.lane.b32.xlu1 %v1180_v1, %s1700_s11  ;;  %v580_v1 = vld [vmem:[#allocation2 + $0x4a] sm:$0x3f] }
 0x197   : > { %1215 = vrot.lane.b32.xlu0 %v1175_v0, %s1700_s11  ;;  %v488_v0 = vld [vmem:[#allocation2 + $0x69] sm:$0x3f]  ;;  %v1270_v39 = vrot.slane %v1269_v59, 2 }
 0x198   : > { %v1138_v4 = vpop.permute.xlu1 %1137 }
 0x199   : > { %v1100_v5 = vpop.permute.xlu0 %1099  ;;  %v1160_v6 = vadd.f32 %v1138_v4, %v1112_v60  ;;  %v949_v4 = vmax.f32 %v947_v47, %v948_v56 }
 0x19a   : > { %1229 = vrot.lane.b32.xlu1 %v1182_v8, %s1700_s11 }
 0x19b   : > { %1227 = vrot.lane.b32.xlu0 %v1181_v7, %s1700_s11  ;;  %v1930_v9 = vadd.f32 %v1206_v63, %v1160_v6 }
 0x19c   : > { %v884_v12 = vpop.permute.xlu1 %883 }
 0x19d   : > { %v904_v13 = vpop.permute.xlu0 %903  ;;  %v928_v14 = vadd.f32 %v884_v12, %v838_v62  ;;  %v1275_v6 = vsel %vm1265_vm2, %v1930_v9, -inf }
 0x19e   : > { %513 = vrot.lane.b32.xlu1 %v478_v16, %s1697_s8  ;;  %v582_v16 = vld [vmem:[#allocation2 + $0x5a] sm:$0x3f] }
 0x19f   : > { %509 = vrot.lane.b32.xlu0 %v476_v15, %s1697_s8  ;;  %v953_v57 = vsel %vm943_vm4, %v928_v14, -inf  ;;  %v490_v15 = vld [vmem:[#allocation2 + $0x79] sm:$0x3f] }
 0x1a0   : > { %v1052_v19 = vpop.permute.xlu1 %1051 }
 0x1a1   : > { %v512_v21 = vpop.permute.xlu0 %511  ;;  %v1069_v22 = vadd.f32 %v1052_v19, %v1021_v18  ;;  %v950_v18 = vrot.slane %v949_v4, 1  ;;  %v1271_v19 = vmax.f32 %v1269_v59, %v1270_v39 }
 0x1a2   : > { %521 = vrot.lane.b32.xlu1 %v482_v33, %s1697_s8  ;;  %v557_v29 = vadd.f32 %v512_v21, %v461_v27 }
 0x1a3   : > { %517 = vrot.lane.b32.xlu0 %v480_v23, %s1697_s8  ;;  %v1117_v30 = vadd.f32 %v1100_v5, %v1069_v22 }
 0x1a4   : > { %v826_v31 = vpop.permute.xlu1 %825 }
 0x1a5   : > { %v608_v25 = vpop.permute.xlu0 %607  ;;  %v843_v32 = vadd.f32 %v826_v31, %v795_v28  ;;  %v586_v28 = vld [vmem:[#allocation2 + $0x7a] sm:$0x3f] }
 0x1a6   : > { %v1941_v34 = vadd.f32 %v608_v25, %v557_v29  ;;  %609 = vrot.lane.b32.xlu1 %v574_v36, %s1698_s9  ;;  %v951_v25 = vmax.f32 %v949_v4, %v950_v18 }
 0x1a7   : > { %605 = vrot.lane.b32.xlu0 %v572_v35, %s1698_s9  ;;  %v938_v40 = vadd.f32 %v904_v13, %v843_v32  ;;  %v1272_v32 = vrot.slane %v1271_v19, 1 }
 0x1a8   : > { %v1148_v41 = vpop.permute.xlu1 %1147 }
 0x1a9   : > { %v532_v43 = vpop.permute.xlu0 %531  ;;  %v1945_v44 = vadd.f32 %v1148_v41, %v1117_v30  ;;  %v998_v24 = vsel %vm943_vm4, %v938_v40, -inf  ;;  %v1408_v41 = vld [vmem:[%s2123_s3] sm:$0xff] }
 0x1aa   : > { %613 = vrot.lane.b32.xlu1 %v576_v46, %s1698_s9  ;;  %v567_v5 = vadd.f32 %v532_v43, %v471_v2  ;;  %v1409_v43 = vld [vmem:[%s2123_s3 + $0x8] sm:$0xff] }
 0x1ab   : > { %525 = vrot.lane.b32.xlu0 %v484_v45, %s1697_s8  ;;  %v1701_v45 = vmov 0.0|0.0   ;;  %v1663_v46 = vpack.c.bf16 %v1409_v43, %v1408_v41 }
 0x1ac   : > { %v882_v50 = vpop.permute.xlu1 %881  ;;  %1662 = vmatprep.subr.bf16.mxu1 %v1701_v45 }
 0x1ad   : > { %v902_v52 = vpop.permute.xlu0 %901  ;;  %v927_v53 = vadd.f32 %v882_v50, %v1941_v34  ;;  %v1017_v50 = vld [vmem:[#allocation2 + $0x28] sm:$0xf]  ;;  %1664 = vmatpush3.bf16.msra.mxu1 %v1663_v46 }
 0x1ae   : > { %617 = vrot.lane.b32.xlu1 %v578_v55, %s1698_s9  ;;  %v1273_v55 = vmax.f32 %v1271_v19, %v1272_v32 }
 0x1af   : > { %529 = vrot.lane.b32.xlu0 %v486_v54, %s1697_s8  ;;  %v952_v58 = vsel %vm941_vm5, %v927_v53, -inf }
 0x1b0   : > { %v954_v60 = vmax.f32 %v952_v58, %v953_v57  ;;  %v1204_v61 = vpop.permute.xlu1 %1203 }
 0x1b1   : > { %v1224_v63 = vpop.permute.xlu0 %1223  ;;  %v1249_v62 = vadd.f32 %v1204_v61, %v927_v53 }
 0x1b2   : > { %v955_v3 = vrot.slane %v954_v60, 4  ;;  %621 = vrot.lane.b32.xlu1 %v580_v1, %s1698_s9 }
 0x1b3   : > { %533 = vrot.lane.b32.xlu0 %v488_v0, %s1697_s8  ;;  %v1274_v7 = vsel %vm1263_vm3, %v1249_v62, -inf  ;;  %v743_v62 = vld [vmem:[#allocation2 + $0x28] sm:$0x1f] }
 0x1b4   : > { %v956_v8 = vmax.f32 %v954_v60, %v955_v3  ;;  %v1276_v11 = vmax.f32 %v1274_v7, %v1275_v6  ;;  %v628_v12 = vpop.permute.xlu1 %627 }
 0x1b5   : > { %v888_v13 = vpop.permute.xlu0 %887  ;;  %v1961_v14 = vadd.f32 %v628_v12, %v567_v5 }
 0x1b6   : > { %v957_v38 = vrot.slane %v956_v8, 2  ;;  %v1277_v17 = vrot.slane %v1276_v11, 4  ;;  %625 = vrot.lane.b32.xlu1 %v582_v16, %s1698_s9 }
 0x1b7   : > { %537 = vrot.lane.b32.xlu0 %v490_v15, %s1697_s8  ;;  %v937_v9 = vadd.f32 %v902_v52, %v1961_v14  ;;  %v1022_v52 = vld [vmem:[#allocation2 + $0x78] sm:$0xf]  ;;  %v463_v15 = vld [vmem:[#allocation2 + $0x20] sm:$0xff] }
 0x1b8   : > { %v958_v21 = vmax.f32 %v956_v8, %v957_v38  ;;  %v1278_v22 = vmax.f32 %v1276_v11, %v1277_v17  ;;  %v1044_v23 = vpop.permute.xlu1 %1043 }
 0x1b9   : > { %v1054_v33 = vpop.permute.xlu0 %1053  ;;  %v997_v26 = vsel %vm941_vm5, %v937_v9, -inf  ;;  %v1968_v27 = vadd.f32 %v1224_v63, %v937_v9  ;;  %v1065_v53 = vadd.f32 %v1044_v23, %v1017_v50  ;;  %v748_v63 = vld [vmem:[#allocation2 + $0x78] sm:$0x1f] }
 0x1ba   : > { %v959_v29 = vrot.slane %v958_v21, 1  ;;  %v1279_v30 = vrot.slane %v1278_v22, 2  ;;  %v1970_v31 = vmax.f32 %v997_v26, %v998_v24  ;;  %633 = vrot.lane.b32.xlu1 %v586_v28, %s1698_s9  ;;  %v1070_v54 = vadd.f32 %v1054_v33, %v1022_v52 }
 0x1bb   : > { %629 = vrot.lane.b32.xlu0 %v584_v48, %s1698_s9 }
 0x1bc   : > { %v960_v35 = vmax.f32 %v958_v21, %v959_v29  ;;  %v1280_v36 = vmax.f32 %v1278_v22, %v1279_v30  ;;  %v770_v40 = vpop.permute.xlu1 %769 }
 0x1bd   : > { %v780_v37 = vpop.permute.xlu0 %779  ;;  %v791_v1 = vadd.f32 %v770_v40, %v743_v62 }
 0x1be   : > { %v1981_v47 = vsel %vm1345_vm6, %v960_v35, %v951_v25  ;;  %v1281_v49 = vrot.slane %v1280_v36, 1  ;;  %v796_v0 = vadd.f32 %v780_v37, %v748_v63  ;;  %v1018_v63 = vld [vmem:[#allocation2 + $0x38] sm:$0xf] }
 0x1c0   : > { %v1282_v56 = vmax.f32 %v1280_v36, %v1281_v49  ;;  %v1092_v58 = vpop.permute.xlu1 %1091 }
 0x1c1   : > { %v1102_v57 = vpop.permute.xlu0 %1101  ;;  %v1113_v60 = vadd.f32 %v1092_v58, %v1065_v53 }
 0x1c2   : > { %v1118_v59 = vadd.f32 %v1102_v57, %v1070_v54  ;;  %v1386_v61 = vsel %vm1345_vm6, %v1282_v56, %v1273_v55 }
 0x1c4   : > { %v818_v3 = vpop.permute.xlu1 %817 }
 0x1c5   : > { %v828_v2 = vpop.permute.xlu0 %827  ;;  %v839_v5 = vadd.f32 %v818_v3, %v791_v1  ;;  %v744_v3 = vld [vmem:[#allocation2 + $0x38] sm:$0x1f] }
 0x1c6   : > { %v1984_v4 = vadd.f32 %v828_v2, %v796_v0 }
 0x1c7   : > { %v930_v6 = vadd.f32 %v888_v13, %v839_v5 }
 0x1c8   : > { %v1140_v39 = vpop.permute.xlu1 %1139 }
 0x1c9   : > { %v1150_v7 = vpop.permute.xlu0 %1149  ;;  %v962_v13 = vsel %vm943_vm4, %v930_v6, -inf  ;;  %v1161_v26 = vadd.f32 %v1140_v39, %v1113_v60 }
 0x1ca   : > { %v1986_v8 = vadd.f32 %v1150_v7, %v1118_v59 }
 0x1cc   : > { %v1210_v11 = vpop.permute.xlu1 %1209 }
 0x1cd   : > { %v516_v12 = vpop.permute.xlu0 %515  ;;  %v1252_v28 = vadd.f32 %v1210_v11, %v1161_v26  ;;  %v465_v11 = vld [vmem:[#allocation2 + $0x30] sm:$0xff] }
 0x1ce   : > { %v559_v17 = vadd.f32 %v516_v12, %v463_v15  ;;  %v473_v12 = vld [vmem:[#allocation2 + $0x70] sm:$0xff] }
 0x1cf   : > { %v1284_v36 = vsel %vm1265_vm2, %v1252_v28, -inf }
 0x1d0   : > { %v1988_v16 = vpop.permute.xlu1 %907 }
 0x1d1   : > { %v612_v38 = vpop.permute.xlu0 %611 }
 0x1d2   : > { %v1990_v18 = vadd.f32 %v612_v38, %v559_v17 }
 0x1d4   : > { %v1992_v9 = vpop.permute.xlu1 %905 }
 0x1d5   : > { %v886_v19 = vpop.permute.xlu0 %885 }
 0x1d6   : > { %v929_v21 = vadd.f32 %v886_v19, %v1990_v18 }
 0x1d8   : > { %v961_v22 = vsel %vm941_vm5, %v929_v21, -inf  ;;  %v772_v24 = vpop.permute.xlu1 %771 }
 0x1d9   : > { %v963_v23 = vmax.f32 %v961_v22, %v962_v13  ;;  %v536_v33 = vpop.permute.xlu0 %535  ;;  %v792_v6 = vadd.f32 %v772_v24, %v744_v3 }
 0x1da   : > { %v569_v17 = vadd.f32 %v536_v33, %v473_v12 }
 0x1db   : > { %v964_v48 = vrot.slane %v963_v23, 4 }
 0x1dc   : > { %v1094_v25 = vpop.permute.xlu1 %1093 }
 0x1dd   : > { %v965_v29 = vmax.f32 %v963_v23, %v964_v48  ;;  %v1208_v30 = vpop.permute.xlu0 %1207 }
 0x1de   : > { %v1251_v32 = vadd.f32 %v1208_v30, %v929_v21 }
 0x1df   : > { %v966_v35 = vrot.slane %v965_v29, 2 }
 0x1e0   : > { %v1283_v37 = vsel %vm1263_vm3, %v1251_v32, -inf  ;;  %v820_v45 = vpop.permute.xlu1 %819 }
 0x1e1   : > { %v967_v40 = vmax.f32 %v965_v29, %v966_v35  ;;  %v1285_v41 = vmax.f32 %v1283_v37, %v1284_v36  ;;  %v632_v43 = vpop.permute.xlu0 %631  ;;  %v840_v15 = vadd.f32 %v820_v45, %v792_v6  ;;  %v940_v37 = vadd.f32 %v1988_v16, %v1984_v4  ;;  %v745_v4 = vld [vmem:[#allocation2 + $0x48] sm:$0x1f] }
 0x1e2   : > { %v2008_v13 = vadd.f32 %v632_v43, %v569_v17 }
 0x1e3   : > { %v968_v46 = vrot.slane %v967_v40, 1  ;;  %v1286_v49 = vrot.slane %v1285_v41, 4 }
 0x1e4   : > { %v1214_v54 = vpop.permute.xlu1 %1213  ;;  %v2016_v35 = vadd.f32 %v1992_v9, %v2008_v13  ;;  %v1313_v9 = vrot.slane %v1921_v51, 4 }
 0x1e5   : > { %v969_v50 = vmax.f32 %v967_v40, %v968_v46  ;;  %v1287_v52 = vmax.f32 %v1285_v41, %v1286_v49  ;;  %v1046_v53 = vpop.permute.xlu0 %1045 }
 0x1e6   : > { %v1066_v0 = vadd.f32 %v1046_v53, %v1018_v63  ;;  %v1006_v49 = vsel %vm941_vm5, %v2016_v35, -inf  ;;  %v1019_v53 = vld [vmem:[#allocation2 + $0x48] sm:$0xf]  ;;  %v1314_v3 = vmax.f32 %v1921_v51, %v1313_v9 }
 0x1e7   : > { %v2001_v55 = vsel %vm1347_vm7, %v969_v50, %v1981_v47  ;;  %v1288_v56 = vrot.slane %v1287_v52, 2 }
 0x1e8   : > { %v616_v59 = vpop.permute.xlu1 %615  ;;  %v1114_v7 = vadd.f32 %v1094_v25, %v1066_v0 }
 0x1e9   : > { %v1289_v57 = vmax.f32 %v1287_v52, %v1288_v56  ;;  %v1142_v58 = vpop.permute.xlu0 %1141 }
 0x1ea   : > { %v1162_v22 = vadd.f32 %v1142_v58, %v1114_v7 }
 0x1eb   : > { %v1290_v60 = vrot.slane %v1289_v57, 1 }
 0x1ec   : > { %v890_v2 = vpop.permute.xlu1 %889  ;;  %v1254_v30 = vadd.f32 %v1214_v54, %v1162_v22  ;;  %v1007_v54 = vsel %vm943_vm4, %v940_v37, -inf }
 0x1ed   : > { %v1291_v62 = vmax.f32 %v1289_v57, %v1290_v60  ;;  %v892_v1 = vpop.permute.xlu0 %891  ;;  %v1008_v57 = vmax.f32 %v1006_v49, %v1007_v54 }
 0x1ee   : > { %v932_v19 = vadd.f32 %v892_v1, %v840_v15  ;;  %v1293_v41 = vsel %vm1265_vm2, %v1254_v30, -inf }
 0x1ef   : > { %v2004_v5 = vsel %vm1347_vm7, %v1291_v62, %v1386_v61  ;;  %v991_v61 = vrot.slane %v1914_v42, 4  ;;  %v1009_v12 = vrot.slane %v1008_v57, 4 }
 0x1f0   : > { %v822_v47 = vpop.permute.xlu1 %821  ;;  %v971_v48 = vsel %vm943_vm4, %v932_v19, -inf }
 0x1f1   : > { %v520_v39 = vpop.permute.xlu0 %519  ;;  %v992_v36 = vmax.f32 %v1914_v42, %v991_v61  ;;  %v1000_v42 = vrot.slane %v1970_v31, 4 }
 0x1f2   : > { %v561_v38 = vadd.f32 %v520_v39, %v465_v11 }
 0x1f3   : > { %v993_v50 = vrot.slane %v992_v36, 2  ;;  %v1001_v6 = vmax.f32 %v1970_v31, %v1000_v42 }
 0x1f4   : > { %v2006_v21 = vadd.f32 %v616_v59, %v561_v38  ;;  %v1144_v26 = vpop.permute.xlu1 %1143  ;;  %v467_v59 = vld [vmem:[#allocation2 + $0x40] sm:$0xff] }
 0x1f5   : > { %v1212_v23 = vpop.permute.xlu0 %1211  ;;  %v994_v62 = vmax.f32 %v992_v36, %v993_v50 }
 0x1f6   : > { %v931_v24 = vadd.f32 %v890_v2, %v2006_v21 }
 0x1f7   : > { %v995_v19 = vrot.slane %v994_v62, 1 }
 0x1f8   : > { %v970_v28 = vsel %vm941_vm5, %v931_v24, -inf  ;;  %v1253_v29 = vadd.f32 %v1212_v23, %v931_v24  ;;  %v1218_v32 = vpop.permute.xlu1 %1217  ;;  %v1315_v24 = vrot.slane %v1314_v3, 2 }
 0x1f9   : > { %v972_v25 = vmax.f32 %v970_v28, %v971_v48  ;;  %v1048_v33 = vpop.permute.xlu0 %1047  ;;  %v1002_v48 = vrot.slane %v1001_v6, 2  ;;  %v2039_v36 = vmax.f32 %v994_v62, %v995_v19  ;;  %v1702_v62 = vmov 0.0  }
 0x1fa   : > { %v1292_v40 = vsel %vm1263_vm3, %v1253_v29, -inf  ;;  %v1067_v16 = vadd.f32 %v1048_v33, %v1019_v53  ;;  %v2037_v33 = vsel %vm667_vm8, %v1893_v10, -inf  ;;  %1649 = vmatprep.subr.mxu1 %v1702_v62  ;;  %1651 = vmatprep.mubr.msk.f32.mxu1 %vm1703_vm15, %v1702_v62 }
 0x1fb   : > { %v973_v43 = vrot.slane %v972_v25, 4  ;;  %v1294_v52 = vmax.f32 %v1292_v40, %v1293_v41 }
 0x1fc   : > { %v524_v46 = vpop.permute.xlu1 %523 }
 0x1fd   : > { %v774_v45 = vpop.permute.xlu0 %773  ;;  %v974_v58 = vmax.f32 %v972_v25, %v973_v43  ;;  %v1295_v0 = vrot.slane %v1294_v52, 4  ;;  %v563_v1 = vadd.f32 %v524_v46, %v467_v59  ;;  %v1003_v43 = vmax.f32 %v1001_v6, %v1002_v48 }
 0x1fe   : > { %v793_v56 = vadd.f32 %v774_v45, %v745_v4  ;;  %v1319_v46 = vsel %vm1263_vm3, %v1968_v27, -inf  ;;  %v1410_v27 = vld [vmem:[%s2123_s3 + $0x10] sm:$0xff] }
 0x1ff   : > { %v975_v15 = vrot.slane %v974_v58, 2  ;;  %v1296_v22 = vmax.f32 %v1294_v52, %v1295_v0  ;;  %1650 = vmatpush3.msra.mxu1 %v1410_v27 }
 0x200   : > { %v620_v63 = vpop.permute.xlu1 %619  ;;  %v841_v11 = vadd.f32 %v822_v47, %v793_v56 }
 0x201   : > { %v1096_v60 = vpop.permute.xlu0 %1095  ;;  %v2030_v39 = vadd.f32 %v620_v63, %v563_v1  ;;  %v976_v29 = vmax.f32 %v974_v58, %v975_v15  ;;  %v1297_v37 = vrot.slane %v1296_v22, 2 }
 0x202   : > { %v1115_v2 = vadd.f32 %v1096_v60, %v1067_v16 }
 0x203   : > { %v977_v53 = vrot.slane %v976_v29, 1  ;;  %v1298_v16 = vmax.f32 %v1296_v22, %v1297_v37 }
 0x204   : > { %v1163_v7 = vadd.f32 %v1144_v26, %v1115_v2  ;;  %v894_v17 = vpop.permute.xlu1 %893  ;;  %v1010_v26 = vmax.f32 %v1008_v57, %v1009_v12  ;;  %v1004_v12 = vrot.slane %v1003_v43, 1 }
 0x205   : > { %v896_v38 = vpop.permute.xlu0 %895  ;;  %v933_v61 = vadd.f32 %v894_v17, %v2030_v39  ;;  %v978_v15 = vmax.f32 %v976_v29, %v977_v53 }
 0x206   : > { %v934_v23 = vadd.f32 %v896_v38, %v841_v11  ;;  %v1256_v28 = vadd.f32 %v1218_v32, %v1163_v7  ;;  %v2042_v32 = vmax.f32 %v1314_v3, %v1315_v24  ;;  %v1011_v52 = vrot.slane %v1010_v26, 2 }
 0x207   : > { %v979_v31 = vsel %vm941_vm5, %v933_v61, -inf  ;;  %v1299_v38 = vrot.slane %v1298_v16, 1  ;;  %v1370_v29 = vsel %vm1349_vm9, %v978_v15, %v2001_v55 }
 0x208   : > { %v980_v51 = vsel %vm943_vm4, %v934_v23, -inf  ;;  %v1226_v25 = vpop.permute.xlu1 %1225  ;;  %v1302_v49 = vsel %vm1265_vm2, %v1256_v28, -inf  ;;  %v1317_v58 = vrot.slane %v2042_v32, 1  ;;  %v1012_v0 = vmax.f32 %v1010_v26, %v1011_v52 }
 0x209   : > { %v981_v47 = vmax.f32 %v979_v31, %v980_v51  ;;  %v1216_v30 = vpop.permute.xlu0 %1215  ;;  %v1260_v41 = vadd.f32 %v1226_v25, %v1945_v44  ;;  %v1005_v25 = vmax.f32 %v1003_v43, %v1004_v12  ;;  %v687_v12 = vsel %vm667_vm8, %v1990_v18, -inf }
 0x20a   : > { %v1255_v40 = vadd.f32 %v1216_v30, %v933_v61  ;;  %v1013_v61 = vrot.slane %v1012_v0, 1  ;;  %v460_v30 = vld [vmem:[#allocation2 + $0x8] sm:$0x3f]  ;;  %v1318_v53 = vmax.f32 %v2042_v32, %v1317_v58 }
 0x20b   : > { %v982_v45 = vrot.slane %v981_v47, 4  ;;  %v1320_v10 = vsel %vm1265_vm2, %v1260_v41, -inf }
 0x20c   : > { %v1301_v50 = vsel %vm1263_vm3, %v1255_v40, -inf  ;;  %v1321_v54 = vmax.f32 %v1319_v46, %v1320_v10  ;;  %v1230_v44 = vpop.permute.xlu1 %1229  ;;  %v1014_v10 = vmax.f32 %v1012_v0, %v1013_v61 }
 0x20d   : > { %v983_v9 = vmax.f32 %v981_v47, %v982_v45  ;;  %v1303_v42 = vmax.f32 %v1301_v50, %v1302_v49  ;;  %v1228_v4 = vpop.permute.xlu0 %1227  ;;  %v1262_v57 = vadd.f32 %v1230_v44, %v1986_v8  ;;  %v1300_v47 = vmax.f32 %v1298_v16, %v1299_v38  ;;  %v462_v45 = vld [vmem:[#allocation2 + $0x18] sm:$0x3f] }
 0x20e   : > { %v1261_v56 = vadd.f32 %v1228_v4, %v2016_v35  ;;  %v1322_v63 = vrot.slane %v1321_v54, 4 }
 0x20f   : > { %v984_v59 = vrot.slane %v983_v9, 2  ;;  %v1304_v60 = vrot.slane %v1303_v42, 4  ;;  %v1329_v2 = vsel %vm1265_vm2, %v1262_v57, -inf  ;;  %v678_v57 = vsel %vm667_vm8, %v1941_v34, -inf }
 0x210   : > { %v1328_v1 = vsel %vm1263_vm3, %v1261_v56, -inf  ;;  %v1323_v3 = vmax.f32 %v1321_v54, %v1322_v63  ;;  %v514_v11 = vpop.permute.xlu1 %513  ;;  %v1388_v56 = vsel %vm1349_vm9, %v1300_v47, %v2004_v5  ;;  %v696_v47 = vsel %vm667_vm8, %v2006_v21, -inf }
 0x211   : > { %v985_v35 = vmax.f32 %v983_v9, %v984_v59  ;;  %v1305_v8 = vmax.f32 %v1303_v42, %v1304_v60  ;;  %v1330_v6 = vmax.f32 %v1328_v1, %v1329_v2  ;;  %v510_v7 = vpop.permute.xlu0 %509  ;;  %v558_v50 = vadd.f32 %v514_v11, %v462_v45  ;;  %v464_v59 = vld [vmem:[#allocation2 + $0x28] sm:$0x3f] }
 0x212   : > { %v1324_v22 = vrot.slane %v1323_v3, 2  ;;  %v556_v49 = vadd.f32 %v510_v7, %v460_v30  ;;  %vm1492_vm2 = vcmask 31744  }
 0x213   : > { %v986_v17 = vrot.slane %v985_v35, 1  ;;  %v1306_v19 = vrot.slane %v1305_v8, 2  ;;  %v1331_v23 = vrot.slane %v1330_v6, 4 }
 0x214   : > { %v1325_v28 = vmax.f32 %v1323_v3, %v1324_v22  ;;  %v522_v26 = vpop.permute.xlu1 %521  ;;  %v466_v3 = vld [vmem:[#allocation2 + $0x38] sm:$0x3f] }
 0x215   : > { %v987_v24 = vmax.f32 %v985_v35, %v986_v17  ;;  %v1307_v48 = vmax.f32 %v1305_v8, %v1306_v19  ;;  %v1332_v51 = vmax.f32 %v1330_v6, %v1331_v23  ;;  %v518_v31 = vpop.permute.xlu0 %517  ;;  %v562_v15 = vadd.f32 %v522_v26, %v466_v3 }
 0x216   : > { %v1326_v40 = vrot.slane %v1325_v28, 1  ;;  %v560_v58 = vadd.f32 %v518_v31, %v464_v59  ;;  %v474_v59 = vld [vmem:[#allocation2 + $0x78] sm:$0x3f]  ;;  %v723_v3 = vsel %vm667_vm8, %v1961_v14, -inf }
 0x217   : > { %v1308_v37 = vrot.slane %v1307_v48, 1  ;;  %v1333_v41 = vrot.slane %v1332_v51, 2  ;;  %v1371_v46 = vsel %vm1351_vm11, %v987_v24, %v1370_v29 }
 0x218   : > { %v1372_v52 = vsel %vm1353_vm12, %v2039_v36, %v1371_v46  ;;  %v610_v55 = vpop.permute.xlu1 %609  ;;  %v1327_v27 = vmax.f32 %v1325_v28, %v1326_v40  ;;  %v468_v28 = vld [vmem:[#allocation2 + $0x48] sm:$0x3f] }
 0x219   : > { %v1309_v43 = vmax.f32 %v1307_v48, %v1308_v37  ;;  %v1334_v9 = vmax.f32 %v1332_v51, %v1333_v41  ;;  %v606_v42 = vpop.permute.xlu0 %605  ;;  %v1373_v54 = vsel %vm1355_vm13, %v1005_v25, %v1372_v52  ;;  %v654_v44 = vadd.f32 %v610_v55, %v558_v50  ;;  %v470_v50 = vld [vmem:[#allocation2 + $0x58] sm:$0x3f] }
 0x21a   : > { %v652_v4 = vadd.f32 %v606_v42, %v556_v49  ;;  %v1374_v16 = vsel %vm1357_vm14, %v1014_v10, %v1373_v54  ;;  %v705_v52 = vsel %vm667_vm8, %v2030_v39, -inf  ;;  %v714_v39 = vsel %vm667_vm8, %v1897_v20, -inf }
 0x21b   : > { %v1335_v36 = vrot.slane %v1334_v9, 1  ;;  %1375 = vrot.lane.b32.xlu0 %v1374_v16, %s1698_s9  ;;  %v1389_v32 = vsel %vm1351_vm11, %v1309_v43, %v1388_v56  ;;  %v679_v63 = vsel %vm669_vm10, %v654_v44, -inf  ;;  %v472_v44 = vld [vmem:[#allocation2 + $0x68] sm:$0x3f] }
 0x21c   : > { %v670_v60 = vsel %vm669_vm10, %v652_v4, -inf  ;;  %v1390_v62 = vsel %vm1353_vm12, %v1318_v53, %v1389_v32  ;;  %v680_v5 = vmax.f32 %v678_v57, %v679_v63  ;;  %v614_v2 = vpop.permute.xlu1 %613 }
 0x21d   : > { %v671_v0 = vmax.f32 %v2037_v33, %v670_v60  ;;  %v526_v1 = vpop.permute.xlu0 %525  ;;  %v1336_v34 = vmax.f32 %v1334_v9, %v1335_v36  ;;  %v1391_v35 = vsel %vm1355_vm13, %v1327_v27, %v1390_v62  ;;  %v656_v8 = vadd.f32 %v614_v2, %v560_v58 }
 0x21e   : > { %v681_v7 = vrot.slane %v680_v5, 4  ;;  %v564_v31 = vadd.f32 %v526_v1, %v468_v28 }
 0x21f   : > { %v672_v6 = vrot.slane %v671_v0, 4  ;;  %v1392_v11 = vsel %vm1357_vm14, %v1336_v34, %v1391_v35  ;;  %v688_v38 = vsel %vm669_vm10, %v656_v8, -inf }
 0x220   : > { %1393 = vrot.lane.b32.xlu1 %v1392_v11, %s1704_s20  ;;  %v682_v17 = vmax.f32 %v680_v5, %v681_v7  ;;  %v689_v19 = vmax.f32 %v687_v12, %v688_v38  ;;  %v618_v23 = vpop.permute.xlu1 %617  ;;  %v732_v11 = vsel %vm667_vm8, %v2008_v13, -inf }
 0x221   : > { %v673_v33 = vmax.f32 %v671_v0, %v672_v6  ;;  %v530_v22 = vpop.permute.xlu0 %529  ;;  %v658_v61 = vadd.f32 %v618_v23, %v562_v15 }
 0x222   : > { %v683_v48 = vrot.slane %v682_v17, 2  ;;  %v690_v51 = vrot.slane %v689_v19, 4  ;;  %v566_v53 = vadd.f32 %v530_v22, %v470_v50 }
 0x223   : > { %v674_v24 = vrot.slane %v673_v33, 2  ;;  %v697_v18 = vsel %vm669_vm10, %v658_v61, -inf }
 0x224   : > { %v684_v30 = vmax.f32 %v682_v17, %v683_v48  ;;  %v691_v25 = vmax.f32 %v689_v19, %v690_v51  ;;  %v698_v29 = vmax.f32 %v696_v47, %v697_v18  ;;  %v622_v40 = vpop.permute.xlu1 %621 }
 0x225   : > { %v675_v26 = vmax.f32 %v673_v33, %v674_v24  ;;  %v534_v37 = vpop.permute.xlu0 %533  ;;  %v660_v41 = vadd.f32 %v622_v40, %v564_v31 }
 0x226   : > { %v685_v46 = vrot.slane %v684_v30, 1  ;;  %v692_v49 = vrot.slane %v691_v25, 2  ;;  %v699_v10 = vrot.slane %v698_v29, 4  ;;  %v568_v32 = vadd.f32 %v534_v37, %v472_v44 }
 0x227   : > { %v676_v45 = vrot.slane %v675_v26, 1  ;;  %v706_v21 = vsel %vm669_vm10, %v660_v41, -inf }
 0x228   : > { %v686_v9 = vmax.f32 %v684_v30, %v685_v46  ;;  %v693_v42 = vmax.f32 %v691_v25, %v692_v49  ;;  %v700_v55 = vmax.f32 %v698_v29, %v699_v10  ;;  %v626_v4 = vpop.permute.xlu1 %625  ;;  %v707_v16 = vmax.f32 %v705_v52, %v706_v21  ;;  %v1583_v21 = vld [vmem:[%s2122_s2] ss:$0 sm:$0xff] }
 0x229   : > { %v677_v43 = vmax.f32 %v675_v26, %v676_v45  ;;  %v538_v54 = vpop.permute.xlu0 %537  ;;  %v662_v56 = vadd.f32 %v626_v4, %v566_v53  ;;  %v1584_v4 = vld [vmem:[%s2124_s4] ss:$0 sm:$0xff] }
 0x22a   : > { %v694_v27 = vrot.slane %v693_v42, 1  ;;  %v701_v36 = vrot.slane %v700_v55, 2  ;;  %v708_v58 = vrot.slane %v707_v16, 4  ;;  %v570_v60 = vadd.f32 %v538_v54, %v474_v59 }
 0x22b   : > { %v1346_v57 = vsel %vm1345_vm6, %v686_v9, %v677_v43  ;;  %v715_v63 = vsel %vm669_vm10, %v662_v56, -inf }
 0x22c   : > { %v695_v62 = vmax.f32 %v693_v42, %v694_v27  ;;  %v702_v0 = vmax.f32 %v700_v55, %v701_v36  ;;  %v716_v5 = vmax.f32 %v714_v39, %v715_v63  ;;  %v634_v2 = vpop.permute.xlu1 %633  ;;  %v709_v34 = vmax.f32 %v707_v16, %v708_v58 }
 0x22d   : > { %v630_v1 = vpop.permute.xlu0 %629  ;;  %v666_v8 = vadd.f32 %v634_v2, %v570_v60 }
 0x22e   : > { %v664_v35 = vadd.f32 %v630_v1, %v568_v32  ;;  %v1348_v6 = vsel %vm1347_vm7, %v695_v62, %v1346_v57  ;;  %v703_v7 = vrot.slane %v702_v0, 1  ;;  %v717_v20 = vrot.slane %v716_v5, 4 }
 0x22f   : > { %v710_v12 = vrot.slane %v709_v34, 2  ;;  %v733_v38 = vsel %vm669_vm10, %v666_v8, -inf }
 0x230   : > { %v724_v15 = vsel %vm669_vm10, %v664_v35, -inf  ;;  %v704_v33 = vmax.f32 %v702_v0, %v703_v7  ;;  %v718_v17 = vmax.f32 %v716_v5, %v717_v20  ;;  %v734_v22 = vmax.f32 %v732_v11, %v733_v38 }
 0x231   : > { %v725_v19 = vmax.f32 %v723_v3, %v724_v15  ;;  %v711_v23 = vmax.f32 %v709_v34, %v710_v12 }
 0x232   : > { %v719_v61 = vrot.slane %v718_v17, 2  ;;  %v735_v14 = vrot.slane %v734_v22, 4  ;;  %v1350_v48 = vsel %vm1349_vm9, %v704_v33, %v1348_v6 }
 0x233   : > { %v726_v24 = vrot.slane %v725_v19, 4  ;;  %v712_v28 = vrot.slane %v711_v23, 1 }
 0x234   : > { %v720_v51 = vmax.f32 %v718_v17, %v719_v61  ;;  %v736_v47 = vmax.f32 %v734_v22, %v735_v14 }
 0x235   : > { %v727_v31 = vmax.f32 %v725_v19, %v726_v24  ;;  %v713_v13 = vmax.f32 %v711_v23, %v712_v28 }
 0x236   : > { %v721_v18 = vrot.slane %v720_v51, 1  ;;  %v737_v30 = vrot.slane %v736_v47, 2 }
 0x237   : > { %v728_v26 = vrot.slane %v727_v31, 2  ;;  %v1352_v25 = vsel %vm1351_vm11, %v713_v13, %v1350_v48 }
 0x238   : > { %v722_v29 = vmax.f32 %v720_v51, %v721_v18  ;;  %v738_v40 = vmax.f32 %v736_v47, %v737_v30 }
 0x239   : > { %v729_v37 = vmax.f32 %v727_v31, %v728_v26 }
 0x23a   : > { %v739_v45 = vrot.slane %v738_v40, 1  ;;  %v1354_v46 = vsel %vm1353_vm12, %v722_v29, %v1352_v25 }
 0x23b   : > { %v730_v41 = vrot.slane %v729_v37, 1 }
 0x23c   : > { %v740_v50 = vmax.f32 %v738_v40, %v739_v45 }
 0x23d   : > { %v731_v49 = vmax.f32 %v729_v37, %v730_v41 }
 0x23f   : > { %v1356_v10 = vsel %vm1355_vm13, %v731_v49, %v1354_v46 }
 0x240   : > { %v1358_v52 = vsel %vm1357_vm14, %v740_v50, %v1356_v10 }
 0x28d   : > { %v1376_v53 = vpop.permute.xlu0 %1375 }
 0x28e   : > { %v1396_v43 = vsel %vm667_vm8, %v1358_v52, %v1376_v53 }
 0x292   : > { %v1394_v9 = vpop.permute.xlu1 %1393 }
 0x293   : > { %v1398_v42 = vsel %vm1397_vm0, %v1396_v43, %v1394_v9 }
 0x294   : > { %v1406_v55 = vadd.f32 %v1583_v21, %v1398_v42 }
 0x296   : > { %v1407_v54 = vmax.f32 %v1406_v55, 0.0 }
 0x298   : > { %1652 = vmatmul.mubr.msk.f32.vlgmr.msra.gmra.mrb[6].mxu1 %vm1418_vm1, %v1407_v54 }
 0x36b   : > { %v1488_v44 = vpop.f32.mrb[6].mxu1 }
 0x36c   : > { %v1489_v16 = vadd.f32 %v1584_v4, %v1488_v44  ;;  %v1653_v56 = vpop.f32.mrb[7].mxu1 }
 0x36e   : > { %v1493_v57 = vsel %vm1492_vm2, %v1489_v16, -inf }
 0x36f   : > { %1494 = vmax.xlane.f32.xlu0 %v1493_v57 }
 0x3fc   : > { %v1495_v27 = vpop.xlane.xlu0 %1494 }
 0x3fd   : > { %v1496_v36 = vsub.f32 %v1489_v16, %v1495_v27 }
 0x3ff   : > { %v1497_v59 = vmul.f32 1.442695, %v1496_v36 }
 0x401   : > { %1685 = vpow2.f32 %v1497_v59 }
 0x40b   : > { %v1686_v39 = vpop.eup %1685 }
 0x40c   : > { %v1499_v32 = vsel %vm1492_vm2, %v1686_v39, 0.0 }
 0x40d   : > { %1500 = vadd.xlane.f32.xlu1 %v1499_v32 }
 0x49a   : > { %v1501_v58 = vpop.xlane.xlu1 %1500 }
 0x49b   : > { %1687 = vrcp.f32 %v1501_v58 }
 0x4a5   : > { %v1688_v60 = vpop.eup %1687 }
 0x4a6   : > { %v1503_v63 = vmul.f32 %v1688_v60, %v1686_v39 }
 0x4a8   : > { %1504 = vst.msk [vmem:[%s227_s28] sm:$0xff] %vm1492_vm2, %v1503_v63 }
 0x4a9 PF: > { %s15_s18 = sadd.s32 1, %s1695_s18  }
 0x4aa   : > { %p12_p5 = scmp.ge.s32.totalorder %s15_s18, 4  }
 0x4ac   :  { %14 = sbr.rel (!%p12_p5) target bundleno = 1 (0x1), region = 70 }

</bundles_post_ra>
